<compile_context>
chip_gen: v6e
topology: v6e:2x2x1
jax: 0.10.0
libtpu: 0.0.40
codegen_flags: <defaults>
</compile_context>

<pallas_src>
import math

import jax
import jax.numpy as jnp
from jax.experimental import pallas as pl
from jax.experimental.pallas import tpu as pltpu


# ----------------------------------------------------------------------------- helpers ----
def _same_pads(H, W, KH, KW, sh, sw):
    """Replicates the padding math done on the module's first forward() call."""
    extra_h = (math.ceil(W / sw) - 1) * sw - W + KW
    extra_v = (math.ceil(H / sh) - 1) * sh - H + KH
    left = extra_h // 2
    right = extra_h - left
    top = extra_v // 2
    bottom = extra_v - top
    return top, bottom, left, right


def _pad_or_crop_nchw(x, top, bottom, left, right):
    """nn.ZeroPad2d semantics: positive pads zero-pad, negative pads crop."""
    N, C, H, W = x.shape
    h0, h1 = max(0, -top), H - max(0, -bottom)
    w0, w1 = max(0, -left), W - max(0, -right)
    if h0 or (h1 != H) or w0 or (w1 != W):
        x = x[:, :, h0:h1, w0:w1]
    pt, pb, pL, pr = max(0, top), max(0, bottom), max(0, left), max(0, right)
    if pt or pb or pL or pr:
        x = jnp.pad(x, ((0, 0), (0, 0), (pt, pb), (pL, pr)))
    return x


def _round_up(v, m):
    return (v + m - 1) // m * m


def _cdiv(a, b):
    return -(-a // b)


def _vmem_budget_bytes():
    """~48 MiB on v7x (64 MiB physical per TC), ~96 MiB on v5e/v6e (128 MiB physical)."""
    try:
        cap = int(pltpu.get_tpu_info().vmem_capacity_bytes)
    except Exception:
        cap = 64 << 20  # conservative (v7x-sized) fallback
    return min((cap * 3) // 4, 96 << 20)


def _pick_tiles(N, Ho, Wo_p, Wos, Cin, Cout, KH, KW, QH, ph_h, ph_w, isz_c, osz, budget):
    """Pick (row-tile th, Cout tile tn, padded Cout_x) so the working set fits the budget."""
    lane = lambda v: _round_up(v, 128)
    sub_m = 8 * max(1, 4 // isz_c)           # sublane multiple for the compute dtype
    sub = lambda v: _round_up(v, sub_m)

    # --- Cout tiling: keep the resident (double-buffered) weight block bounded (v7x!) ---
    if Cout < 128:
        Cout_x = tn = Cout                    # small Cout: store unpadded (masked vst,
    else:                                     # but 16x fewer output HBM bytes)
        Cout_x = _round_up(Cout, 128)
        tn = Cout_x
        while tn > 128 and 2 * KH * KW * sub(Cin) * lane(tn) * isz_c > budget // 3:
            tn = _round_up(tn // 2, 128)
        Cout_x = _round_up(Cout_x, tn)
    num_n = Cout_x // tn

    w_bytes = 2 * KH * KW * sub(Cin) * lane(tn) * isz_c + 2 * 8 * lane(tn) * 4
    per_row_x = ph_h * sub(ph_w * Wos) * lane(Cin) * isz_c      # one output row's input slab
    per_row = (2 * per_row_x                                    # x block (double buffered)
               + 2 * Wo_p * lane(tn) * osz                      # out block (double buffered)
               + Wo_p * lane(tn) * 4                            # f32 accumulator value
               + 2 * sub(Wo_p) * lane(Cin) * isz_c)             # per-tap patch temporaries
    fixed = w_bytes + 2 * (QH - 1) * per_row_x + (4 << 20)      # + slack
    th = (budget - fixed) // per_row if budget > fixed else 1
    th = int(max(1, min(th, Ho, max(1, 8192 // Wo_p))))
    # v7x megacore: make sure there are >=2 parallel grid tiles when possible.
    if N * _cdiv(Ho, th) * num_n < 2 and Ho >= 2:
        th = _cdiv(Ho, 2)
    return th, tn, Cout_x


# ------------------------------------------------------------------------------ kernel ----
def _make_conv_kernel(KH, KW, sh, sw, TH, WOP, THQ, WOS, Cin):
    """Conv over one (row-tile, Cout-tile) block.  All slice bounds are Python-static."""

    def kernel(x_ref, w_ref, b_ref, o_ref):
        # x_ref: (1, ph_h*THQ, ph_w*WOS, Cin)   phase-split input window for this row tile
        # w_ref: (KH*KW, Cin, tn)               per-tap weights
        # b_ref: (1, tn) float32                bias
        # o_ref: (TH*WOP, tn)                   output tile
        acc = None
        for kh in range(KH):
            rh, qh = kh % sh, kh // sh
            for kw in range(KW):
                rw, qw = kw % sw, kw // sw
                a0 = rh * THQ + qh
                b0 = rw * WOS + qw
                patch = x_ref[0, a0:a0 + TH, b0:b0 + WOP, :].reshape(TH * WOP, Cin)
                part = jnp.dot(patch, w_ref[kh * KW + kw],
                               preferred_element_type=jnp.float32)
                acc = part if acc is None else acc + part
        o_ref[...] = (acc + b_ref[...]).astype(o_ref.dtype)

    return kernel


# ----------------------------------------------------------------------------- wrapper ----
def conv2d_static_same_padding(x, weight, bias, stride=(1, 1), *,
                               compute_dtype=None, out_dtype=None, data_format="NCHW"):
    """Forward pass of Conv2dStaticSamePadding (groups=1, dilation=1).

    x:       (N, Cin, H, W)       NCHW, like PyTorch
    weight:  (Cout, Cin, KH, KW)  PyTorch OIHW convention
    bias:    (Cout,) or None
    stride:  int / (sh,) / (sh, sw)
    compute_dtype: MXU operand dtype; default bf16 for f32 inputs (f32 accumulation),
                   pass jnp.float32 for the strict-f32 path.
    out_dtype:     output dtype (default: x.dtype)
    data_format:   "NCHW" (default, matches PyTorch) or "NHWC" (skips the final transpose)
    """
    # TODO(synk): groups > 1 and dilation > 1 are not implemented (module defaults are 1).
    N, Cin, H, W = x.shape
    Cout, Cin_w, KH, KW = weight.shape
    assert Cin_w == Cin
    if isinstance(stride, int):
        stride = (stride, stride)
    elif len(stride) == 1:
        stride = (stride[0], stride[0])
    sh, sw = int(stride[0]), int(stride[1])

    # --- static "same" padding (ZeroPad2d or Identity), exactly as the module does ---
    top, bottom, left, right = _same_pads(H, W, KH, KW, sh, sw)
    if left > 0 or right > 0 or top > 0 or bottom > 0:
        xp = _pad_or_crop_nchw(x, top, bottom, left, right)
    else:
        xp = x  # Identity (matches the module even if some pads are negative)
    Hp, Wp = xp.shape[-2:]
    Ho = (Hp - KH) // sh + 1
    Wo = (Wp - KW) // sw + 1
    assert Ho > 0 and Wo > 0

    # --- dtypes: bf16 MXU path by default for f32 inputs ---
    if compute_dtype is None:
        compute_dtype = jnp.bfloat16 if jnp.dtype(x.dtype) == jnp.float32 else x.dtype
    compute_dtype = jnp.dtype(compute_dtype)
    out_dtype = jnp.dtype(out_dtype) if out_dtype is not None else jnp.dtype(x.dtype)
    isz_c, osz = compute_dtype.itemsize, out_dtype.itemsize

    # --- stride-phase constants: the stride is folded away in the wrapper so the kernel
    #     only ever takes static, contiguous slices of its input block ---
    ph_h, ph_w = min(sh, KH), min(sw, KW)      # phases that are actually read
    QH, QW = _cdiv(KH, sh), _cdiv(KW, sw)      # taps per phase
    sub_m = 8 * max(1, 4 // isz_c)             # sublane multiple for compute dtype
    Wo_p = _round_up(Wo, sub_m)                # layout-aligned output width
    Wos = Wo_p + QW - 1                        # per-tile W extent (phase coords)

    budget = _vmem_budget_bytes()
    TH, tn, Cout_x = _pick_tiles(N, Ho, Wo_p, Wos, Cin, Cout, KH, KW, QH,
                                 ph_h, ph_w, isz_c, osz, budget)
    T_i = _cdiv(Ho, TH)                        # row tiles per image
    THQ = TH + QH - 1

    # --- one layout pass: NHWC + early cast + zero-pad + phase split + row-tile gather
    #     (only (QH-1) rows of duplication per tile boundary; no (M, K) im2col) ---
    Hos_big = _cdiv(max(Hp, (T_i * TH + QH - 1) * sh), sh)
    Wos_big = _cdiv(max(Wp, Wos * sw), sw)
    xph = jnp.transpose(xp, (0, 2, 3, 1)).astype(compute_dtype)           # NHWC, cast early
    xph = jnp.pad(xph, ((0, 0), (0, Hos_big * sh - Hp), (0, Wos_big * sw - Wp), (0, 0)))
    xph = xph.reshape(N, Hos_big, sh, Wos_big, sw, Cin)[:, :, :ph_h, :Wos, :ph_w, :]
    xph = jnp.transpose(xph, (0, 2, 1, 4, 3, 5))       # (N, ph_h, Hos_big, ph_w, Wos, Cin)
    idx = (jnp.arange(T_i) * TH)[:, None] + jnp.arange(THQ)               # (T_i, THQ)
    xg = xph[:, :, idx]                                # (N, ph_h, T_i, THQ, ph_w, Wos, Cin)
    xg = jnp.transpose(xg, (0, 2, 1, 3, 4, 5, 6)).reshape(
        N * T_i, ph_h * THQ, ph_w * Wos, Cin)

    # --- weight (tap, Cin, Cout_x) and bias (1, Cout_x) ---
    wk = jnp.transpose(weight, (2, 3, 1, 0)).reshape(KH * KW, Cin, Cout).astype(compute_dtype)
    if Cout_x != Cout:
        wk = jnp.pad(wk, ((0, 0), (0, 0), (0, Cout_x - Cout)))
    bias_row = jnp.zeros((1, Cout_x), jnp.float32)
    if bias is not None:
        bias_row = bias_row.at[0, :Cout].set(bias.astype(jnp.float32))

    num_m = N * T_i
    num_n = Cout_x // tn
    M_p = num_m * TH * Wo_p

    kernel = _make_conv_kernel(KH, KW, sh, sw, TH, Wo_p, THQ, Wos, Cin)

    # Grid ordering: keep whichever operand would be re-read more as the slow-varying axis.
    xg_bytes = xg.size * isz_c
    wk_bytes = wk.size * isz_c
    if num_n > 1 and (num_m - 1) * wk_bytes > (num_n - 1) * xg_bytes:
        grid = (num_n, num_m)
        x_map = lambda j, i: (i, 0, 0, 0)
        w_map = lambda j, i: (0, 0, j)
        b_map = lambda j, i: (0, j)
        o_map = lambda j, i: (i, j)
    else:
        grid = (num_m, num_n)
        x_map = lambda i, j: (i, 0, 0, 0)
        w_map = lambda i, j: (0, 0, j)
        b_map = lambda i, j: (0, j)
        o_map = lambda i, j: (i, j)

    out = pl.pallas_call(
        kernel,
        out_shape=jax.ShapeDtypeStruct((M_p, Cout_x), out_dtype),
        grid_spec=pltpu.PrefetchScalarGridSpec(
            num_scalar_prefetch=0,
            grid=grid,
            in_specs=[
                pl.BlockSpec((1, ph_h * THQ, ph_w * Wos, Cin), x_map),
                pl.BlockSpec((KH * KW, Cin, tn), w_map),
                pl.BlockSpec((1, tn), b_map),
            ],
            out_specs=pl.BlockSpec((TH * Wo_p, tn), o_map),
        ),
        compiler_params=pltpu.CompilerParams(
            dimension_semantics=("parallel", "parallel"),
            vmem_limit_bytes=int(budget),
        ),
        cost_estimate=pl.CostEstimate(
            flops=2 * N * Ho * Wo * KH * KW * Cin * Cout,
            transcendentals=0,
            bytes_accessed=int(xg_bytes + wk_bytes + Cout_x * 4 + M_p * Cout_x * osz),
        ),
    )(xg, wk, bias_row)

    out = out.reshape(N, T_i * TH, Wo_p, Cout_x)[:, :Ho, :Wo, :Cout]     # drop tile padding
    if data_format == "NHWC":
        return out
    return jnp.transpose(out, (0, 3, 1, 2))  # back to NCHW


# -------------------------------------------------------------------------------- test ----
if __name__ == "__main__":
    key = jax.random.PRNGKey(0)

    def reference(x, weight, bias, stride):
        top, bottom, left, right = _same_pads(x.shape[2], x.shape[3],
                                              weight.shape[2], weight.shape[3], *stride)
        if left > 0 or right > 0 or top > 0 or bottom > 0:
            pads = ((top, bottom), (left, right))
        else:
            pads = ((0, 0), (0, 0))          # Identity branch of the module
        y = jax.lax.conv_general_dilated(
            x, weight, window_strides=stride, padding=pads,
            dimension_numbers=("NCHW", "OIHW", "NCHW"))
        return y + bias[None, :, None, None]

    # Test 1: module config Conv2dStaticSamePadding(in=4, out=8, kernel_size=3, stride=2)
    k1, k2, k3 = jax.random.split(key, 3)
    x = jax.random.normal(k1, (2, 4, 16, 16), jnp.float32)
    w = jax.random.normal(k2, (8, 4, 3, 3), jnp.float32) * 0.1
    b = jax.random.normal(k3, (8,), jnp.float32) * 0.1
    ref = reference(x, w, b, (2, 2))

    # Default path: bf16 MXU operands, f32 accumulation.
    y = jax.block_until_ready(conv2d_static_same_padding(x, w, b, (2, 2)))
    assert y.shape == ref.shape, (y.shape, ref.shape)
    assert jnp.allclose(y, ref, atol=3e-2, rtol=3e-2), float(jnp.max(jnp.abs(y - ref)))

    # Strict-f32 opt-out path.
    y32 = jax.block_until_ready(
        conv2d_static_same_padding(x, w, b, (2, 2), compute_dtype=jnp.float32))
    assert jnp.allclose(y32, ref, atol=2e-2, rtol=2e-2), float(jnp.max(jnp.abs(y32 - ref)))

    # Test 2: stride 1, shapes that exercise partial row tiles and Wo lane padding.
    k4, k5, k6 = jax.random.split(k3, 3)
    x2 = jax.random.normal(k4, (1, 5, 13, 13), jnp.float32)
    w2 = jax.random.normal(k5, (6, 5, 3, 3), jnp.float32) * 0.1
    b2 = jax.random.normal(k6, (6,), jnp.float32) * 0.1
    ref2 = reference(x2, w2, b2, (1, 1))
    y2 = jax.block_until_ready(conv2d_static_same_padding(x2, w2, b2, (1, 1)))
    assert y2.shape == ref2.shape, (y2.shape, ref2.shape)
    assert jnp.allclose(y2, ref2, atol=3e-2, rtol=3e-2), float(jnp.max(jnp.abs(y2 - ref2)))

    print("KERNEL_OK")
</pallas_src>

<mosaic_0001>
module attributes {stable_mosaic.version = 11 : i64} {
  func.func @kernel(%arg0: i32, %arg1: i32, %arg2: memref<1x18x34x4xbf16, #tpu.memory_space<vmem>>, %arg3: memref<9x4x8xbf16, #tpu.memory_space<vmem>>, %arg4: memref<1x8xf32, #tpu.memory_space<vmem>>, %arg5: memref<128x8xf32, #tpu.memory_space<vmem>>) attributes {dimension_semantics = [#tpu.dimension_semantics<parallel>, #tpu.dimension_semantics<parallel>], iteration_bounds = array<i64: 2, 1>, scalar_prefetch = 0 : i64, scratch_operands = 0 : i64, tpu.core_type = #tpu.core_type<tc>, window_params = [{transform_indices = @transform_0, window_bounds = array<i64: 1, 18, 34, 4>}, {transform_indices = @transform_1, window_bounds = array<i64: 9, 4, 8>}, {transform_indices = @transform_2, window_bounds = array<i64: 1, 8>}, {transform_indices = @transform_3, window_bounds = array<i64: 128, 8>}]} {
    %c0 = arith.constant 0 : index
    %c0_0 = arith.constant 0 : index
    %c0_1 = arith.constant 0 : index
    %c0_2 = arith.constant 0 : index
    %0 = vector.load %arg2[%c0, %c0_0, %c0_1, %c0_2] : memref<1x18x34x4xbf16, #tpu.memory_space<vmem>>, vector<1x8x16x4xbf16>
    %1 = vector.shape_cast %0 : vector<1x8x16x4xbf16> to vector<8x16x4xbf16>
    %2 = vector.shape_cast %1 : vector<8x16x4xbf16> to vector<128x4xbf16>
    %c0_3 = arith.constant 0 : index
    %c0_4 = arith.constant 0 : index
    %c0_5 = arith.constant 0 : index
    %3 = vector.load %arg3[%c0_3, %c0_4, %c0_5] : memref<9x4x8xbf16, #tpu.memory_space<vmem>>, vector<1x4x8xbf16>
    %4 = vector.shape_cast %3 : vector<1x4x8xbf16> to vector<4x8xbf16>
    %cst = arith.constant dense<0.000000e+00> : vector<128x8xf32>
    %5 = tpu.matmul %2, %4, %cst {dimension_numbers = #tpu.dot_dimension_numbers<[1], [0], [0], [1], [0, 0, 1, 1], [], []>} : vector<128x4xbf16>, vector<4x8xbf16>, vector<128x8xf32> -> vector<128x8xf32>
    %c0_6 = arith.constant 0 : index
    %c0_7 = arith.constant 0 : index
    %c17 = arith.constant 17 : index
    %c0_8 = arith.constant 0 : index
    %6 = vector.load %arg2[%c0_6, %c0_7, %c17, %c0_8] : memref<1x18x34x4xbf16, #tpu.memory_space<vmem>>, vector<1x8x16x4xbf16>
    %7 = vector.shape_cast %6 : vector<1x8x16x4xbf16> to vector<8x16x4xbf16>
    %8 = vector.shape_cast %7 : vector<8x16x4xbf16> to vector<128x4xbf16>
    %c1 = arith.constant 1 : index
    %c0_9 = arith.constant 0 : index
    %c0_10 = arith.constant 0 : index
    %9 = vector.load %arg3[%c1, %c0_9, %c0_10] : memref<9x4x8xbf16, #tpu.memory_space<vmem>>, vector<1x4x8xbf16>
    %10 = vector.shape_cast %9 : vector<1x4x8xbf16> to vector<4x8xbf16>
    %cst_11 = arith.constant dense<0.000000e+00> : vector<128x8xf32>
    %11 = tpu.matmul %8, %10, %cst_11 {dimension_numbers = #tpu.dot_dimension_numbers<[1], [0], [0], [1], [0, 0, 1, 1], [], []>} : vector<128x4xbf16>, vector<4x8xbf16>, vector<128x8xf32> -> vector<128x8xf32>
    %12 = arith.addf %5, %11 : vector<128x8xf32>
    %c0_12 = arith.constant 0 : index
    %c0_13 = arith.constant 0 : index
    %c1_14 = arith.constant 1 : index
    %c0_15 = arith.constant 0 : index
    %13 = vector.load %arg2[%c0_12, %c0_13, %c1_14, %c0_15] : memref<1x18x34x4xbf16, #tpu.memory_space<vmem>>, vector<1x8x16x4xbf16>
    %14 = vector.shape_cast %13 : vector<1x8x16x4xbf16> to vector<8x16x4xbf16>
    %15 = vector.shape_cast %14 : vector<8x16x4xbf16> to vector<128x4xbf16>
    %c2 = arith.constant 2 : index
    %c0_16 = arith.constant 0 : index
    %c0_17 = arith.constant 0 : index
    %16 = vector.load %arg3[%c2, %c0_16, %c0_17] : memref<9x4x8xbf16, #tpu.memory_space<vmem>>, vector<1x4x8xbf16>
    %17 = vector.shape_cast %16 : vector<1x4x8xbf16> to vector<4x8xbf16>
    %cst_18 = arith.constant dense<0.000000e+00> : vector<128x8xf32>
    %18 = tpu.matmul %15, %17, %cst_18 {dimension_numbers = #tpu.dot_dimension_numbers<[1], [0], [0], [1], [0, 0, 1, 1], [], []>} : vector<128x4xbf16>, vector<4x8xbf16>, vector<128x8xf32> -> vector<128x8xf32>
    %19 = arith.addf %12, %18 : vector<128x8xf32>
    %c0_19 = arith.constant 0 : index
    %c9 = arith.constant 9 : index
    %c0_20 = arith.constant 0 : index
    %c0_21 = arith.constant 0 : index
    %20 = vector.load %arg2[%c0_19, %c9, %c0_20, %c0_21] : memref<1x18x34x4xbf16, #tpu.memory_space<vmem>>, vector<1x8x16x4xbf16>
    %21 = vector.shape_cast %20 : vector<1x8x16x4xbf16> to vector<8x16x4xbf16>
    %22 = vector.shape_cast %21 : vector<8x16x4xbf16> to vector<128x4xbf16>
    %c3 = arith.constant 3 : index
    %c0_22 = arith.constant 0 : index
    %c0_23 = arith.constant 0 : index
    %23 = vector.load %arg3[%c3, %c0_22, %c0_23] : memref<9x4x8xbf16, #tpu.memory_space<vmem>>, vector<1x4x8xbf16>
    %24 = vector.shape_cast %23 : vector<1x4x8xbf16> to vector<4x8xbf16>
    %cst_24 = arith.constant dense<0.000000e+00> : vector<128x8xf32>
    %25 = tpu.matmul %22, %24, %cst_24 {dimension_numbers = #tpu.dot_dimension_numbers<[1], [0], [0], [1], [0, 0, 1, 1], [], []>} : vector<128x4xbf16>, vector<4x8xbf16>, vector<128x8xf32> -> vector<128x8xf32>
    %26 = arith.addf %19, %25 : vector<128x8xf32>
    %c0_25 = arith.constant 0 : index
    %c9_26 = arith.constant 9 : index
    %c17_27 = arith.constant 17 : index
    %c0_28 = arith.constant 0 : index
    %27 = vector.load %arg2[%c0_25, %c9_26, %c17_27, %c0_28] : memref<1x18x34x4xbf16, #tpu.memory_space<vmem>>, vector<1x8x16x4xbf16>
    %28 = vector.shape_cast %27 : vector<1x8x16x4xbf16> to vector<8x16x4xbf16>
    %29 = vector.shape_cast %28 : vector<8x16x4xbf16> to vector<128x4xbf16>
    %c4 = arith.constant 4 : index
    %c0_29 = arith.constant 0 : index
    %c0_30 = arith.constant 0 : index
    %30 = vector.load %arg3[%c4, %c0_29, %c0_30] : memref<9x4x8xbf16, #tpu.memory_space<vmem>>, vector<1x4x8xbf16>
    %31 = vector.shape_cast %30 : vector<1x4x8xbf16> to vector<4x8xbf16>
    %cst_31 = arith.constant dense<0.000000e+00> : vector<128x8xf32>
    %32 = tpu.matmul %29, %31, %cst_31 {dimension_numbers = #tpu.dot_dimension_numbers<[1], [0], [0], [1], [0, 0, 1, 1], [], []>} : vector<128x4xbf16>, vector<4x8xbf16>, vector<128x8xf32> -> vector<128x8xf32>
    %33 = arith.addf %26, %32 : vector<128x8xf32>
    %c0_32 = arith.constant 0 : index
    %c9_33 = arith.constant 9 : index
    %c1_34 = arith.constant 1 : index
    %c0_35 = arith.constant 0 : index
    %34 = vector.load %arg2[%c0_32, %c9_33, %c1_34, %c0_35] : memref<1x18x34x4xbf16, #tpu.memory_space<vmem>>, vector<1x8x16x4xbf16>
    %35 = vector.shape_cast %34 : vector<1x8x16x4xbf16> to vector<8x16x4xbf16>
    %36 = vector.shape_cast %35 : vector<8x16x4xbf16> to vector<128x4xbf16>
    %c5 = arith.constant 5 : index
    %c0_36 = arith.constant 0 : index
    %c0_37 = arith.constant 0 : index
    %37 = vector.load %arg3[%c5, %c0_36, %c0_37] : memref<9x4x8xbf16, #tpu.memory_space<vmem>>, vector<1x4x8xbf16>
    %38 = vector.shape_cast %37 : vector<1x4x8xbf16> to vector<4x8xbf16>
    %cst_38 = arith.constant dense<0.000000e+00> : vector<128x8xf32>
    %39 = tpu.matmul %36, %38, %cst_38 {dimension_numbers = #tpu.dot_dimension_numbers<[1], [0], [0], [1], [0, 0, 1, 1], [], []>} : vector<128x4xbf16>, vector<4x8xbf16>, vector<128x8xf32> -> vector<128x8xf32>
    %40 = arith.addf %33, %39 : vector<128x8xf32>
    %c0_39 = arith.constant 0 : index
    %c1_40 = arith.constant 1 : index
    %c0_41 = arith.constant 0 : index
    %c0_42 = arith.constant 0 : index
    %41 = vector.load %arg2[%c0_39, %c1_40, %c0_41, %c0_42] : memref<1x18x34x4xbf16, #tpu.memory_space<vmem>>, vector<1x8x16x4xbf16>
    %42 = vector.shape_cast %41 : vector<1x8x16x4xbf16> to vector<8x16x4xbf16>
    %43 = vector.shape_cast %42 : vector<8x16x4xbf16> to vector<128x4xbf16>
    %c6 = arith.constant 6 : index
    %c0_43 = arith.constant 0 : index
    %c0_44 = arith.constant 0 : index
    %44 = vector.load %arg3[%c6, %c0_43, %c0_44] : memref<9x4x8xbf16, #tpu.memory_space<vmem>>, vector<1x4x8xbf16>
    %45 = vector.shape_cast %44 : vector<1x4x8xbf16> to vector<4x8xbf16>
    %cst_45 = arith.constant dense<0.000000e+00> : vector<128x8xf32>
    %46 = tpu.matmul %43, %45, %cst_45 {dimension_numbers = #tpu.dot_dimension_numbers<[1], [0], [0], [1], [0, 0, 1, 1], [], []>} : vector<128x4xbf16>, vector<4x8xbf16>, vector<128x8xf32> -> vector<128x8xf32>
    %47 = arith.addf %40, %46 : vector<128x8xf32>
    %c0_46 = arith.constant 0 : index
    %c1_47 = arith.constant 1 : index
    %c17_48 = arith.constant 17 : index
    %c0_49 = arith.constant 0 : index
    %48 = vector.load %arg2[%c0_46, %c1_47, %c17_48, %c0_49] : memref<1x18x34x4xbf16, #tpu.memory_space<vmem>>, vector<1x8x16x4xbf16>
    %49 = vector.shape_cast %48 : vector<1x8x16x4xbf16> to vector<8x16x4xbf16>
    %50 = vector.shape_cast %49 : vector<8x16x4xbf16> to vector<128x4xbf16>
    %c7 = arith.constant 7 : index
    %c0_50 = arith.constant 0 : index
    %c0_51 = arith.constant 0 : index
    %51 = vector.load %arg3[%c7, %c0_50, %c0_51] : memref<9x4x8xbf16, #tpu.memory_space<vmem>>, vector<1x4x8xbf16>
    %52 = vector.shape_cast %51 : vector<1x4x8xbf16> to vector<4x8xbf16>
    %cst_52 = arith.constant dense<0.000000e+00> : vector<128x8xf32>
    %53 = tpu.matmul %50, %52, %cst_52 {dimension_numbers = #tpu.dot_dimension_numbers<[1], [0], [0], [1], [0, 0, 1, 1], [], []>} : vector<128x4xbf16>, vector<4x8xbf16>, vector<128x8xf32> -> vector<128x8xf32>
    %54 = arith.addf %47, %53 : vector<128x8xf32>
    %c0_53 = arith.constant 0 : index
    %c1_54 = arith.constant 1 : index
    %c1_55 = arith.constant 1 : index
    %c0_56 = arith.constant 0 : index
    %55 = vector.load %arg2[%c0_53, %c1_54, %c1_55, %c0_56] : memref<1x18x34x4xbf16, #tpu.memory_space<vmem>>, vector<1x8x16x4xbf16>
    %56 = vector.shape_cast %55 : vector<1x8x16x4xbf16> to vector<8x16x4xbf16>
    %57 = vector.shape_cast %56 : vector<8x16x4xbf16> to vector<128x4xbf16>
    %c8 = arith.constant 8 : index
    %c0_57 = arith.constant 0 : index
    %c0_58 = arith.constant 0 : index
    %58 = vector.load %arg3[%c8, %c0_57, %c0_58] : memref<9x4x8xbf16, #tpu.memory_space<vmem>>, vector<1x4x8xbf16>
    %59 = vector.shape_cast %58 : vector<1x4x8xbf16> to vector<4x8xbf16>
    %cst_59 = arith.constant dense<0.000000e+00> : vector<128x8xf32>
    %60 = tpu.matmul %57, %59, %cst_59 {dimension_numbers = #tpu.dot_dimension_numbers<[1], [0], [0], [1], [0, 0, 1, 1], [], []>} : vector<128x4xbf16>, vector<4x8xbf16>, vector<128x8xf32> -> vector<128x8xf32>
    %61 = arith.addf %54, %60 : vector<128x8xf32>
    %c0_60 = arith.constant 0 : index
    %c0_61 = arith.constant 0 : index
    %62 = vector.load %arg4[%c0_60, %c0_61] : memref<1x8xf32, #tpu.memory_space<vmem>>, vector<1x8xf32>
    %63 = vector.broadcast %62 : vector<1x8xf32> to vector<128x8xf32>
    %64 = arith.addf %61, %63 : vector<128x8xf32>
    %c0_62 = arith.constant 0 : index
    %c0_63 = arith.constant 0 : index
    %65 = vector.load %arg5[%c0_62, %c0_63] : memref<128x8xf32, #tpu.memory_space<vmem>>, vector<128x8xf32>
    tpu.vector_store %arg5[%c0_62, %c0_63], %64 {strides = array<i32>} : memref<128x8xf32, #tpu.memory_space<vmem>>, vector<128x8xf32>,
    return
  }
  func.func @transform_0(%arg0: i32, %arg1: i32) -> (i32, i32, i32, i32) {
    %c0_i32 = arith.constant 0 : i32
    %c0_i32_0 = arith.constant 0 : i32
    %c0_i32_1 = arith.constant 0 : i32
    %c0_i32_2 = arith.constant 0 : i32
    return %arg0, %c0_i32, %c0_i32_0, %c0_i32_1 : i32, i32, i32, i32
  }
  func.func @transform_1(%arg0: i32, %arg1: i32) -> (i32, i32, i32) {
    %c0_i32 = arith.constant 0 : i32
    %c0_i32_0 = arith.constant 0 : i32
    %c0_i32_1 = arith.constant 0 : i32
    return %c0_i32, %c0_i32_0, %arg1 : i32, i32, i32
  }
  func.func @transform_2(%arg0: i32, %arg1: i32) -> (i32, i32) {
    %c0_i32 = arith.constant 0 : i32
    %c0_i32_0 = arith.constant 0 : i32
    return %c0_i32, %arg1 : i32, i32
  }
  func.func @transform_3(%arg0: i32, %arg1: i32) -> (i32, i32) {
    %c0_i32 = arith.constant 0 : i32
    return %arg0, %arg1 : i32, i32
  }
}

</mosaic_0001>

<bundles_post_ra>
// kernel: tpu_custom_call.1
= control target key start
LH: loop header
LB: loop body
LE: loop exit
PB: predicated region body
PF: predicated region fallthrough
CT: control target
= control target key end

     0   :  { %s3867_s12 = smov 0   ;;  %s3869_s13 = smov 0   ;;  %s4638_s0 = inlined_call_operand.vmem [shape: bf16[2,18,34,4], index: 0, kind: input, shape index: {}]   ;;  %s4639_s1 = inlined_call_operand.vmem [shape: bf16[9,4,8], index: 1, kind: input, shape index: {}]   ;;  %s4640_s2 = inlined_call_operand.vmem [shape: f32[1,8], index: 2, kind: input, shape index: {}]   ;;  %s4641_s3 = inlined_call_operand.vmem [shape: f32[256,8], index: 3, kind: output, shape index: {}]  }
   0x1   :  { %s3871_s14 = smov 0  }
   0x2 LB: > { %s25_s15 = sadd.s32 1, %s3841_s13  ;;  %p3232_p0 = scmp.ge.s32.totalorder %s3845_s14, 1  ;;  %s3845_s14 = sphi %s3871_s14, %s13_s14   ;;  %s3841_s13 = sphi %s3869_s13, %s4645_s13   ;;  %s3837_s12 = sphi %s3867_s12, %s4644_s12  }
   0x3   : > { %p27_p1 = scmp.ge.s32.totalorder %s25_s15, 2  ;;  %p168_p2 = scmp.lt.s32.totalorder %s3845_s14, 3 }
   0x5   : > { %s4647_s15 = smov (%p27_p1, %s25_s15), 0  ;;  %p169_p3 = pnand %p3232_p0, %p168_p2 }
   0x6   : > { %p202_p4 = scmp.lt.s32.totalorder (!%p169_p3), %s3837_s12, 1  ;;  %s3234_s16 = sshll.u32 (!%p169_p3), %s3837_s12, 4 }
   0x7   : > { %172 = sbr.rel (%p169_p3) target bundleno = 433 (0x1b1), region = 32  ;;  %p215_p5 = scmp.lt.s32.totalorder (!%p169_p3), %s3234_s16, 31 }
   0xc   : > { %v3236_v0 = vld [vmem:[%s4639_s1 + $0x2] sm:$0x3]  ;;  %vm511_vm0 = vcmask 1041408   ;;  %v240_v2 = vld [vmem:[%s4639_s1] sm:$0x3]  ;;  %s203_s20 = scalar_select %p202_p4, %s3837_s12, 1 }
   0xd   : > { %3765 = vmatprep.subr.msk.bf16.mxu1 %vm511_vm0, %v3236_v0  ;;  %3764 = vmatprep.subr.msk.bf16.mxu0 %vm511_vm0, %v3236_v0  ;;  %v513_v1 = vsel %vm511_vm0, %v3236_v0, 0  ;;  %vm265_vm1 = vsmask.f32 3328  ;;  %v3269_v3 = vld [vmem:[%s4639_s1 + $0x4] sm:$0x3]  ;;  %v3919_v7 = vsel %vm511_vm0, %v240_v2, 0 }
   0xe   : > { %3763 = vmatpush3.bf16.msra.mxu1 %v513_v1  ;;  %3601 = vmatpush3.bf16.msra.mxu0 %v513_v1  ;;  %v3904_v4 = vld [vmem:[%s4639_s1 + $0x6] sm:$0x3]  ;;  %vm266_vm2 = vsmask.f32 7440  ;;  %v3911_v5 = vld [vmem:[%s4639_s1 + $0x8] sm:$0x3] }
   0xf   : > { %3766 = vmatprep.subr.msk.bf16.mxu1 %vm511_vm0, %v240_v2  ;;  %3767 = vmatprep.subr.msk.bf16.mxu0 %vm511_vm0, %v3269_v3  ;;  %v3916_v6 = vld [vmem:[%s4639_s1 + $0xa] sm:$0x3]  ;;  %s3774_s29 = smul.u32 360, %s203_s20  ;;  %v3922_v8 = vsel %vm511_vm0, %v3269_v3, 0  ;;  %v3927_v9 = vld [vmem:[%s4639_s1 + $0xc] sm:$0x3]  ;;  %vm3978_vm4 = vmor %vm265_vm1, %vm266_vm2 }
  0x10   : > { %v3931_v10 = vsel %vm511_vm0, %v3904_v4, 0  ;;  %v3935_v11 = vsel %vm511_vm0, %v3911_v5, 0  ;;  %v3940_v12 = vld [vmem:[%s4639_s1 + $0xe] sm:$0x3]  ;;  %v3945_v13 = vld [vmem:[%s4639_s1 + $0x10] sm:$0x3] }
  0x11   : > { %s3950_s11 = scalar_lea.vmem %s4638_s0, %s3774_s29  ;;  %v3954_v14 = vsel %vm511_vm0, %v3916_v6, 0  ;;  %v3958_v15 = vsel %vm511_vm0, %v3927_v9, 0  ;;  %v3962_v16 = vsel %vm511_vm0, %v3940_v12, 0  ;;  %v3966_v17 = vsel %vm511_vm0, %v3945_v13, 0  ;;  %s4649_s16 = smov (!%p215_p5, %s3234_s16), 31 }
  0x12   : > { %v241_v18 = vld [vmem:[%s3950_s11 + $0x8] sm:$0xf]  ;;  %v242_v19 = vld [vmem:[%s3950_s11 + $0xc] sm:$0xf]  ;;  %v243_v20 = vld [vmem:[%s3950_s11 + $0x10] sm:$0x1] }
  0x13   : > { %v269_v21 = vshrl.u32 %v241_v18, 16  ;;  %v272_v22 = vshll.u32 %v241_v18, 16  ;;  %v278_v23 = vshll.u32 %v242_v19, 16  ;;  %v282_v24 = vshrl.u32 %v242_v19, 16  ;;  %v253_v25 = vld [vmem:[%s3950_s11 + $0x58] sm:$0xf] }
  0x14   : > { %vm486_vm3 = vcmask 31744   ;;  %v288_v26 = vshll.u32 %v243_v20, 16  ;;  %v254_v27 = vld [vmem:[%s3950_s11 + $0x5c] sm:$0xf]  ;;  %v255_v28 = vld [vmem:[%s3950_s11 + $0x60] sm:$0x1] }
  0x15   : > { %v365_v29 = vshrl.u32 %v253_v25, 16  ;;  %v271_v30 = vrot.slane %v269_v21, 4  ;;  %v274_v31 = vrot.slane %v272_v22, 5  ;;  %v280_v32 = vrot.slane %v278_v23, 5  ;;  %v244_v34 = vld [vmem:[%s3950_s11 + $0x1c] sm:$0xf] }
  0x16   : > { %v284_v33 = vrot.slane %v282_v24, 4  ;;  %v290_v35 = vrot.slane %v288_v26, 5  ;;  %v368_v37 = vshll.u32 %v253_v25, 16  ;;  %v374_v38 = vshll.u32 %v254_v27, 16  ;;  %v245_v43 = vld [vmem:[%s3950_s11 + $0x20] sm:$0xf] }
  0x17   : > { %v367_v36 = vrot.slane %v365_v29, 4  ;;  %v275_v39 = vor.u32 %v274_v31, %v271_v30  ;;  %v378_v41 = vshrl.u32 %v254_v27, 16  ;;  %v384_v42 = vshll.u32 %v255_v28, 16  ;;  %v246_v53 = vld [vmem:[%s3950_s11 + $0x24] sm:$0x1]  ;;  %s3235_s12 = sshll.u32 %s4649_s16, 3 }
  0x18   : > { %v285_v40 = vor.u32 %v284_v33, %v280_v32  ;;  %v370_v45 = vrot.slane %v368_v37, 5  ;;  %v376_v46 = vrot.slane %v374_v38, 5  ;;  %v293_v47 = vshrl.u32 %v244_v34, 16  ;;  %v256_v58 = vld [vmem:[%s3950_s11 + $0x6c] sm:$0xf]  ;;  %s4543_s21 = scalar_lea.vmem %s4641_s3, %s3235_s12 }
  0x19   : > { %v296_v48 = vshll.u32 %v244_v34, 16  ;;  %v276_v49 = vrot.slane %v275_v39, 4  ;;  %v380_v51 = vrot.slane %v378_v41, 4  ;;  %v386_v52 = vrot.slane %v384_v42, 5  ;;  %v257_v63 = vld [vmem:[%s3950_s11 + $0x70] sm:$0xf] }
  0x1a   : > { %v286_v50 = vrot.slane %v285_v40, 4  ;;  %v371_v54 = vor.u32 %v370_v45, %v367_v36  ;;  %v295_v55 = vrot.slane %v293_v47, 4  ;;  %v302_v57 = vshll.u32 %v245_v43, 16  ;;  %v258_v21 = vld [vmem:[%s3950_s11 + $0x74] sm:$0x1] }
  0x1b   : > { %v298_v56 = vrot.slane %v296_v48, 5  ;;  %v281_v59 = vsel %vm3978_vm4, %v276_v49, %v280_v32  ;;  %v381_v61 = vor.u32 %v380_v51, %v376_v46  ;;  %v306_v62 = vshrl.u32 %v245_v43, 16  ;;  %v247_v27 = vld [vmem:[%s3950_s11 + $0x30] sm:$0xf]  ;;  %v248_v32 = vld [vmem:[%s3950_s11 + $0x34] sm:$0xf] }
  0x1c   : > { %v291_v60 = vsel %vm3978_vm4, %v286_v50, %v290_v35  ;;  %v372_v1 = vrot.slane %v371_v54, 4  ;;  %v304_v3 = vrot.slane %v302_v57, 5  ;;  %v312_v20 = vshll.u32 %v246_v53, 16  ;;  %v249_v37 = vld [vmem:[%s3950_s11 + $0x38] sm:$0x1] }
  0x1d   : > { %v3237_v0 = vcombine.low %v281_v59, %v291_v60  ;;  %v299_v2 = vor.u32 %v298_v56, %v295_v55  ;;  %v382_v18 = vrot.slane %v381_v61, 4  ;;  %v308_v19 = vrot.slane %v306_v62, 4  ;;  %v259_v38 = vld [vmem:[%s3950_s11 + $0x80] sm:$0xf]  ;;  %v260_v43 = vld [vmem:[%s3950_s11 + $0x84] sm:$0xf] }
  0x1e   : > { %v389_v22 = vshrl.u32 %v256_v58, 16  ;;  %v377_v23 = vsel %vm3978_vm4, %v372_v1, %v376_v46  ;;  %v392_v25 = vshll.u32 %v256_v58, 16  ;;  %v398_v26 = vshll.u32 %v257_v63, 16  ;;  %v261_v60 = vld [vmem:[%s3950_s11 + $0x88] sm:$0x1] }
  0x1f   : > { %3602 = vmatprep.mubr.msk.bf16.mxu0 %vm486_vm3, %v3237_v0  ;;  %v300_v24 = vrot.slane %v299_v2, 4  ;;  %v387_v28 = vsel %vm3978_vm4, %v382_v18, %v386_v52  ;;  %v309_v29 = vor.u32 %v308_v19, %v304_v3  ;;  %v314_v30 = vrot.slane %v312_v20, 5  ;;  %v250_v2 = vld [vmem:[%s3950_s11 + $0x44] sm:$0xf] }
  0x20   : > { %v391_v31 = vrot.slane %v389_v22, 4  ;;  %v3241_v33 = vcombine.low %v377_v23, %v387_v28  ;;  %v394_v35 = vrot.slane %v392_v25, 5  ;;  %v400_v36 = vrot.slane %v398_v26, 5  ;;  %v251_v25 = vld [vmem:[%s3950_s11 + $0x48] sm:$0xf] }
  0x21   : > { %v305_v34 = vsel %vm3978_vm4, %v300_v24, %v304_v3  ;;  %v310_v39 = vrot.slane %v309_v29, 4  ;;  %v402_v40 = vshrl.u32 %v257_v63, 16  ;;  %v408_v41 = vshll.u32 %v258_v21, 16  ;;  %v252_v29 = vld [vmem:[%s3950_s11 + $0x4c] sm:$0x1] }
  0x22   : > { %v317_v42 = vshrl.u32 %v247_v27, 16  ;;  %3610 = vmatprep.mubr.msk.bf16.mxu1 %vm486_vm3, %v3241_v33  ;;  %v395_v45 = vor.u32 %v394_v35, %v391_v31  ;;  %v320_v46 = vshll.u32 %v247_v27, 16  ;;  %v326_v47 = vshll.u32 %v248_v32, 16 }
  0x23   : > { %v330_v48 = vshrl.u32 %v248_v32, 16  ;;  %v315_v49 = vsel %vm3978_vm4, %v310_v39, %v314_v30  ;;  %v404_v50 = vrot.slane %v402_v40, 4  ;;  %v410_v51 = vrot.slane %v408_v41, 5 }
  0x24   : > { %v319_v52 = vrot.slane %v317_v42, 4  ;;  %v3238_v53 = vcombine.low %v305_v34, %v315_v49  ;;  %v396_v54 = vrot.slane %v395_v45, 4  ;;  %v322_v55 = vrot.slane %v320_v46, 5  ;;  %v262_v34 = vld [vmem:[%s3950_s11 + $0x94] sm:$0xf] }
  0x25   : > { %v328_v56 = vrot.slane %v326_v47, 5  ;;  %v405_v57 = vor.u32 %v404_v50, %v400_v36  ;;  %v332_v58 = vrot.slane %v330_v48, 4  ;;  %v336_v59 = vshll.u32 %v249_v37, 16  ;;  %v263_v42 = vld [vmem:[%s3950_s11 + $0x98] sm:$0xf] }
  0x26   : > { %v413_v61 = vshrl.u32 %v259_v38, 16  ;;  %3603 = vmatmul.mubr.msk.bf16.vlgmr.msra.gmra.mxu0 %vm486_vm3, %v3238_v53  ;;  %v401_v62 = vsel %vm3978_vm4, %v396_v54, %v400_v36  ;;  %v323_v63 = vor.u32 %v322_v55, %v319_v52  ;;  %v416_v0 = vshll.u32 %v259_v38, 16  ;;  %v776_v49 = vld [vmem:[%s3950_s11] sm:$0xf] }
  0x27   : > { %v422_v1 = vshll.u32 %v260_v43, 16  ;;  %v406_v3 = vrot.slane %v405_v57, 4  ;;  %3637 = vmatpush3.bf16.msra.mxu0 %v3922_v8  ;;  %v333_v18 = vor.u32 %v332_v58, %v328_v56  ;;  %v338_v19 = vrot.slane %v336_v59, 5 }
  0x28   : > { %v415_v20 = vrot.slane %v413_v61, 4  ;;  %v324_v21 = vrot.slane %v323_v63, 4  ;;  %v418_v22 = vrot.slane %v416_v0, 5  ;;  %v426_v24 = vshrl.u32 %v260_v43, 16  ;;  %3769 = vmatprep.subr.msk.bf16.mxu0 %vm511_vm0, %v3911_v5  ;;  %v264_v43 = vld [vmem:[%s3950_s11 + $0x9c] sm:$0x1] }
  0x29   : > { %v424_v23 = vrot.slane %v422_v1, 5  ;;  %v411_v26 = vsel %vm3978_vm4, %v406_v3, %v410_v51  ;;  %v334_v27 = vrot.slane %v333_v18, 4  ;;  %v432_v28 = vshll.u32 %v261_v60, 16  ;;  %v777_v1 = vld [vmem:[%s3950_s11 + $0x4] sm:$0xf] }
  0x2a   : > { %v341_v8 = vshrl.u32 %v250_v2, 16  ;;  %v3242_v30 = vcombine.low %v401_v62, %v411_v26  ;;  %v329_v31 = vsel %vm3978_vm4, %v324_v21, %v328_v56  ;;  %v419_v32 = vor.u32 %v418_v22, %v415_v20 }
  0x2b   : > { %v428_v33 = vrot.slane %v426_v24, 4  ;;  %v339_v35 = vsel %vm3978_vm4, %v334_v27, %v338_v19  ;;  %v434_v5 = vrot.slane %v432_v28, 5  ;;  %v344_v37 = vshll.u32 %v250_v2, 16  ;;  %v778_v2 = vld [vmem:[%s3950_s11 + $0x8] sm:$0x1] }
  0x2c   : > { %v343_v36 = vrot.slane %v341_v8, 4  ;;  %3611 = vmatmul.mubr.msk.bf16.vlgmr.msra.gmra.mxu1 %vm486_vm3, %v3242_v30  ;;  %v3239_v38 = vcombine.low %v329_v31, %v339_v35  ;;  %v420_v39 = vrot.slane %v419_v32, 4  ;;  %v350_v41 = vshll.u32 %v251_v25, 16  ;;  %v779_v28 = vld [vmem:[%s3950_s11 + $0x14] sm:$0xf] }
  0x2d   : > { %v429_v40 = vor.u32 %v428_v33, %v424_v23  ;;  %3619 = vmatpush3.bf16.msra.mxu1 %v3919_v7  ;;  %v346_v45 = vrot.slane %v344_v37, 5  ;;  %v354_v46 = vshrl.u32 %v251_v25, 16  ;;  %v360_v47 = vshll.u32 %v252_v29, 16  ;;  %v780_v32 = vld [vmem:[%s3950_s11 + $0x18] sm:$0xf] }
  0x2e   : > { %v437_v48 = vshrl.u32 %v262_v34, 16  ;;  %3606 = vmatprep.mubr.msk.bf16.mxu0 %vm486_vm3, %v3239_v38  ;;  %v425_v50 = vsel %vm3978_vm4, %v420_v39, %v424_v23  ;;  %v352_v52 = vrot.slane %v350_v41, 5  ;;  %v440_v53 = vshll.u32 %v262_v34, 16  ;;  %3768 = vmatprep.subr.msk.bf16.mxu1 %vm511_vm0, %v3904_v4 }
  0x2f   : > { %v430_v51 = vrot.slane %v429_v40, 4  ;;  %v347_v54 = vor.u32 %v346_v45, %v343_v36  ;;  %v356_v7 = vrot.slane %v354_v46, 4  ;;  %v362_v55 = vrot.slane %v360_v47, 5  ;;  %v781_v36 = vld [vmem:[%s3950_s11 + $0x1c] sm:$0x1] }
  0x30   : > { %v439_v56 = vrot.slane %v437_v48, 4  ;;  %v442_v58 = vrot.slane %v440_v53, 5  ;;  %v446_v59 = vshll.u32 %v263_v42, 16  ;;  %v450_v60 = vshrl.u32 %v263_v42, 16  ;;  %v3799_v42 = vld [vmem:[%s3950_s11] sm:$0xff]  }
  0x31   : > { %v435_v57 = vsel %vm3978_vm4, %v430_v51, %v434_v5  ;;  %v348_v62 = vrot.slane %v347_v54, 4  ;;  %v357_v63 = vor.u32 %v356_v7, %v352_v52  ;;  %v456_v0 = vshll.u32 %v264_v43, 16  ;;  %v782_v47 = vld [vmem:[%s3950_s11 + $0x28] sm:$0xf] }
  0x32   : > { %v3243_v61 = vcombine.low %v425_v50, %v435_v57  ;;  %v443_v3 = vor.u32 %v442_v58, %v439_v56  ;;  %v448_v18 = vrot.slane %v446_v59, 5  ;;  %v452_v4 = vrot.slane %v450_v60, 4 }
  0x33   : > { %v801_v19 = vshrl.u32 %v776_v49, 16  ;;  %v353_v20 = vsel %vm3978_vm4, %v348_v62, %v352_v52  ;;  %v358_v21 = vrot.slane %v357_v63, 4  ;;  %v458_v22 = vrot.slane %v456_v0, 5  ;;  %v783_v52 = vld [vmem:[%s3950_s11 + $0x2c] sm:$0xf] }
  0x34   : > { %3614 = vmatprep.mubr.msk.bf16.mxu1 %vm486_vm3, %v3243_v61  ;;  %v804_v23 = vshll.u32 %v776_v49, 16  ;;  %v444_v24 = vrot.slane %v443_v3, 4  ;;  %v453_v25 = vor.u32 %v452_v4, %v448_v18  ;;  %v810_v27 = vshll.u32 %v777_v1, 16  ;;  %v784_v63 = vld [vmem:[%s3950_s11 + $0x30] sm:$0x1] }
  0x35   : > { %v803_v26 = vrot.slane %v801_v19, 4  ;;  %v363_v29 = vsel %vm3978_vm4, %v358_v21, %v362_v55  ;;  %v814_v30 = vshrl.u32 %v777_v1, 16  ;;  %v820_v31 = vshll.u32 %v778_v2, 16  ;;  %v785_v1 = vld [vmem:[%s3950_s11 + $0x3c] sm:$0xf]  ;;  %v3800_v21 = vld [vmem:[%s3950_s11 + $0x14] sm:$0xff]  }
  0x36   : > { %v806_v8 = vrot.slane %v804_v23, 5  ;;  %v3240_v33 = vcombine.low %v353_v20, %v363_v29  ;;  %v449_v34 = vsel %vm3978_vm4, %v444_v24, %v448_v18  ;;  %v454_v35 = vrot.slane %v453_v25, 4  ;;  %v786_v19 = vld [vmem:[%s3950_s11 + $0x40] sm:$0xf]  ;;  %v3801_v25 = vld [vmem:[%s3950_s11 + $0x28] sm:$0xff]  }
  0x37   : > { %v812_v5 = vrot.slane %v810_v27, 5  ;;  %v816_v38 = vrot.slane %v814_v30, 4  ;;  %v822_v39 = vrot.slane %v820_v31, 5  ;;  %v825_v40 = vshrl.u32 %v779_v28, 16  ;;  %v787_v31 = vld [vmem:[%s3950_s11 + $0x44] sm:$0x1] }
  0x38   : > { %v807_v37 = vor.u32 %v806_v8, %v803_v26  ;;  %3607 = vmatmul.mubr.msk.bf16.gmra.mxu0 %vm486_vm3, %v3240_v33  ;;  %v459_v41 = vsel %vm3978_vm4, %v454_v35, %v458_v22  ;;  %v828_v43 = vshll.u32 %v779_v28, 16  ;;  %v834_v45 = vshll.u32 %v780_v32, 16 }
  0x39   : > { %v838_v46 = vshrl.u32 %v780_v32, 16  ;;  %v3244_v48 = vcombine.low %v449_v34, %v459_v41  ;;  %v817_v50 = vor.u32 %v816_v38, %v812_v5  ;;  %v827_v51 = vrot.slane %v825_v40, 4  ;;  %v788_v34 = vld [vmem:[%s3950_s11 + $0x50] sm:$0xf]  ;;  %v789_v38 = vld [vmem:[%s3950_s11 + $0x54] sm:$0xf] }
  0x3a   : > { %v808_v49 = vrot.slane %v807_v37, 4  ;;  %v830_v53 = vrot.slane %v828_v43, 5  ;;  %v836_v54 = vrot.slane %v834_v45, 5  ;;  %v844_v55 = vshll.u32 %v781_v36, 16 }
  0x3b   : > { %v840_v7 = vrot.slane %v838_v46, 4  ;;  %3615 = vmatmul.mubr.msk.bf16.gmra.mxu1 %vm486_vm3, %v3244_v48  ;;  %v818_v57 = vrot.slane %v817_v50, 4  ;;  %v849_v58 = vshrl.u32 %v782_v47, 16  ;;  %v852_v59 = vshll.u32 %v782_v47, 16  ;;  %v790_v47 = vld [vmem:[%s3950_s11 + $0x58] sm:$0x1] }
  0x3c   : > { %v813_v56 = vsel %vm3978_vm4, %v808_v49, %v812_v5  ;;  %3620 = vmatprep.mubr.msk.bf16.mxu1 %vm486_vm3, %v3799_v42  ;;  %v831_v60 = vor.u32 %v830_v53, %v827_v51  ;;  %v846_v62 = vrot.slane %v844_v55, 5  ;;  %v858_v0 = vshll.u32 %v783_v52, 16  ;;  %v791_v53 = vld [vmem:[%s3950_s11 + $0x64] sm:$0xf] }
  0x3d   : > { %v841_v61 = vor.u32 %v840_v7, %v836_v54  ;;  %v823_v2 = vsel %vm3978_vm4, %v818_v57, %v822_v39  ;;  %v851_v3 = vrot.slane %v849_v58, 4  ;;  %v854_v18 = vrot.slane %v852_v59, 5  ;;  %v3802_v7 = vld [vmem:[%s3950_s11 + $0x3c] sm:$0xff]   ;;  %v792_v58 = vld [vmem:[%s3950_s11 + $0x68] sm:$0xf] }
  0x3e   : > { %v862_v4 = vshrl.u32 %v783_v52, 16  ;;  %v3270_v20 = vcombine.low %v813_v56, %v823_v2  ;;  %v832_v22 = vrot.slane %v831_v60, 4  ;;  %v860_v24 = vrot.slane %v858_v0, 5  ;;  %v3803_v60 = vld [vmem:[%s3950_s11 + $0x50] sm:$0xff]  }
  0x3f   : > { %v842_v23 = vrot.slane %v841_v61, 4  ;;  %v855_v26 = vor.u32 %v854_v18, %v851_v3  ;;  %v868_v28 = vshll.u32 %v784_v63, 16  ;;  %v873_v29 = vshrl.u32 %v785_v1, 16 }
  0x40   : > { %v864_v27 = vrot.slane %v862_v4, 4  ;;  %3638 = vmatprep.mubr.msk.bf16.mxu0 %vm486_vm3, %v3270_v20  ;;  %v837_v8 = vsel %vm3978_vm4, %v832_v22, %v836_v54  ;;  %v876_v32 = vshll.u32 %v785_v1, 16  ;;  %v882_v33 = vshll.u32 %v786_v19, 16  ;;  %v793_v1 = vld [vmem:[%s3950_s11 + $0x6c] sm:$0x1] }
  0x41   : > { %v847_v30 = vsel %vm3978_vm4, %v842_v23, %v846_v62  ;;  %v856_v5 = vrot.slane %v855_v26, 4  ;;  %v870_v37 = vrot.slane %v868_v28, 5  ;;  %v875_v39 = vrot.slane %v873_v29, 4  ;;  %v795_v20 = vld [vmem:[%s3950_s11 + $0x7c] sm:$0xf] }
  0x42   : > { %v3271_v35 = vcombine.low %v837_v8, %v847_v30  ;;  %v865_v36 = vor.u32 %v864_v27, %v860_v24  ;;  %v878_v40 = vrot.slane %v876_v32, 5  ;;  %v884_v41 = vrot.slane %v882_v33, 5 }
  0x43   : > { %v886_v42 = vshrl.u32 %v786_v19, 16  ;;  %3621 = vmatmul.mubr.msk.bf16.vlgmr.msra.gmra.mxu1 %vm486_vm3, %v3800_v21  ;;  %v861_v43 = vsel %vm3978_vm4, %v856_v5, %v860_v24  ;;  %v892_v46 = vshll.u32 %v787_v31, 16  ;;  %v897_v48 = vshrl.u32 %v788_v34, 16  ;;  %v794_v19 = vld [vmem:[%s3950_s11 + $0x78] sm:$0xf] }
  0x44   : > { %3639 = vmatmul.mubr.msk.bf16.vlgmr.msra.gmra.mxu0 %vm486_vm3, %v3271_v35  ;;  %v866_v45 = vrot.slane %v865_v36, 4  ;;  %3655 = vmatpush3.bf16.msra.mxu1 %v3931_v10  ;;  %v879_v49 = vor.u32 %v878_v40, %v875_v39  ;;  %v900_v51 = vshll.u32 %v788_v34, 16  ;;  %v906_v52 = vshll.u32 %v789_v38, 16  ;;  %v796_v34 = vld [vmem:[%s3950_s11 + $0x80] sm:$0x1] }
  0x45   : > { %3673 = vmatpush3.bf16.msra.mxu0 %v3935_v11  ;;  %v888_v50 = vrot.slane %v886_v42, 4  ;;  %3624 = vmatprep.mubr.msk.bf16.mxu1 %vm486_vm3, %v3801_v25  ;;  %v894_v55 = vrot.slane %v892_v46, 5  ;;  %v899_v56 = vrot.slane %v897_v48, 4  ;;  %v910_v57 = vshrl.u32 %v789_v38, 16  ;;  %v797_v5 = vld [vmem:[%s3950_s11 + $0x8c] sm:$0xf] }
  0x46   : > { %v871_v54 = vsel %vm3978_vm4, %v866_v45, %v870_v37  ;;  %3770 = vmatprep.subr.msk.bf16.mxu1 %vm511_vm0, %v3916_v6  ;;  %v880_v11 = vrot.slane %v879_v49, 4  ;;  %v902_v61 = vrot.slane %v900_v51, 5  ;;  %3771 = vmatprep.subr.msk.bf16.mxu0 %vm511_vm0, %v3927_v9  ;;  %v908_v62 = vrot.slane %v906_v52, 5  ;;  %v3804_v37 = vld [vmem:[%s3950_s11 + $0x64] sm:$0xff]   ;;  %v798_v46 = vld [vmem:[%s3950_s11 + $0x90] sm:$0xf] }
  0x47   : > { %v3272_v10 = vcombine.low %v861_v43, %v871_v54  ;;  %v889_v59 = vor.u32 %v888_v50, %v884_v41  ;;  %v912_v63 = vrot.slane %v910_v57, 4  ;;  %v916_v0 = vshll.u32 %v790_v47, 16  ;;  %v799_v51 = vld [vmem:[%s3950_s11 + $0x94] sm:$0x1]  ;;  %v3319_v52 = vld [vmem:[%s3950_s11 + $0xbc] sm:$0xf] }
  0x48   : > { %v921_v2 = vshrl.u32 %v791_v53, 16  ;;  %v885_v6 = vsel %vm3978_vm4, %v880_v11, %v884_v41  ;;  %v903_v18 = vor.u32 %v902_v61, %v899_v56  ;;  %v924_v4 = vshll.u32 %v791_v53, 16  ;;  %v3320_v57 = vld [vmem:[%s3950_s11 + $0xc0] sm:$0xf] }
  0x49   : > { %3642 = vmatprep.mubr.msk.bf16.mxu0 %vm486_vm3, %v3272_v10  ;;  %v890_v3 = vrot.slane %v889_v59, 4  ;;  %v913_v21 = vor.u32 %v912_v63, %v908_v62  ;;  %v918_v22 = vrot.slane %v916_v0, 5  ;;  %v930_v9 = vshll.u32 %v792_v58, 16 }
  0x4a   : > { %v923_v23 = vrot.slane %v921_v2, 4  ;;  %v904_v25 = vrot.slane %v903_v18, 4  ;;  %v926_v26 = vrot.slane %v924_v4, 5  ;;  %v934_v27 = vshrl.u32 %v792_v58, 16 }
  0x4b   : > { %v895_v24 = vsel %vm3978_vm4, %v890_v3, %v894_v55  ;;  %3625 = vmatmul.mubr.msk.bf16.gmra.mxu1 %vm486_vm3, %v3802_v7  ;;  %v914_v29 = vrot.slane %v913_v21, 4  ;;  %v932_v8 = vrot.slane %v930_v9, 5  ;;  %v940_v30 = vshll.u32 %v793_v1, 16  ;;  %v3805_v7 = vld [vmem:[%s3950_s11 + $0x78] sm:$0xff]   ;;  %v3321_v3 = vld [vmem:[%s3950_s11 + $0xc4] sm:$0x1] }
  0x4c   : > { %v3273_v28 = vcombine.low %v885_v6, %v895_v24  ;;  %3628 = vmatprep.mubr.msk.bf16.mxu1 %vm486_vm3, %v3803_v60  ;;  %v909_v31 = vsel %vm3978_vm4, %v904_v25, %v908_v62  ;;  %v927_v32 = vor.u32 %v926_v26, %v923_v23  ;;  %v936_v33 = vrot.slane %v934_v27, 4  ;;  %v3322_v21 = vld [vmem:[%s3950_s11 + $0xd0] sm:$0xf] }
  0x4d   : > { %v945_v35 = vshrl.u32 %v794_v19, 16  ;;  %v919_v36 = vsel %vm3978_vm4, %v914_v29, %v918_v22  ;;  %v942_v38 = vrot.slane %v940_v30, 5  ;;  %v948_v39 = vshll.u32 %v794_v19, 16  ;;  %v3806_v25 = vld [vmem:[%s3950_s11 + $0x8c] sm:$0xff]   ;;  %v3807_v30 = vld [vmem:[%s3950_s11 + $0xb4] sm:$0xff]  }
  0x4e   : > { %3643 = vmatmul.mubr.msk.bf16.gmra.mxu0 %vm486_vm3, %v3273_v28  ;;  %v954_v40 = vshll.u32 %v795_v20, 16  ;;  %v3274_v41 = vcombine.low %v909_v31, %v919_v36  ;;  %v928_v42 = vrot.slane %v927_v32, 4  ;;  %v937_v43 = vor.u32 %v936_v33, %v932_v8 }
  0x4f   : > { %v947_v45 = vrot.slane %v945_v35, 4  ;;  %v950_v47 = vrot.slane %v948_v39, 5  ;;  %v958_v49 = vshrl.u32 %v795_v20, 16  ;;  %v964_v50 = vshll.u32 %v796_v34, 16  ;;  %v3323_v34 = vld [vmem:[%s3950_s11 + $0xd4] sm:$0xf] }
  0x50   : > { %v956_v48 = vrot.slane %v954_v40, 5  ;;  %3646 = vmatprep.mubr.msk.bf16.mxu0 %vm486_vm3, %v3274_v41  ;;  %v933_v53 = vsel %vm3978_vm4, %v928_v42, %v932_v8  ;;  %v938_v54 = vrot.slane %v937_v43, 4  ;;  %v969_v55 = vshrl.u32 %v797_v5, 16  ;;  %v3325_v39 = vld [vmem:[%s3950_s11 + $0xe4] sm:$0xf] }
  0x51   : > { %v972_v56 = vshll.u32 %v797_v5, 16  ;;  %v951_v58 = vor.u32 %v950_v47, %v947_v45  ;;  %v960_v10 = vrot.slane %v958_v49, 4  ;;  %v966_v11 = vrot.slane %v964_v50, 5 }
  0x52   : > { %v978_v59 = vshll.u32 %v798_v46, 16  ;;  %v943_v60 = vsel %vm3978_vm4, %v938_v54, %v942_v38  ;;  %v971_v61 = vrot.slane %v969_v55, 4  ;;  %v982_v63 = vshrl.u32 %v798_v46, 16  ;;  %v3324_v38 = vld [vmem:[%s3950_s11 + $0xd8] sm:$0x1] }
  0x53   : > { %v974_v62 = vrot.slane %v972_v56, 5  ;;  %3629 = vmatmul.mubr.msk.bf16.gmra.mxu1 %vm486_vm3, %v3804_v37  ;;  %v3275_v0 = vcombine.low %v933_v53, %v943_v60  ;;  %v952_v1 = vrot.slane %v951_v58, 4  ;;  %v961_v2 = vor.u32 %v960_v10, %v956_v48  ;;  %v3326_v53 = vld [vmem:[%s3950_s11 + $0xe8] sm:$0xf] }
  0x54   : > { %v980_v6 = vrot.slane %v978_v59, 5  ;;  %3632 = vmatprep.mubr.msk.bf16.mxu1 %vm486_vm3, %v3805_v7  ;;  %v984_v4 = vrot.slane %v982_v63, 4  ;;  %v988_v19 = vshll.u32 %v799_v51, 16  ;;  %v1382_v20 = vshrl.u32 %v3319_v52, 16 }
  0x55   : > { %v975_v18 = vor.u32 %v974_v62, %v971_v61  ;;  %v957_v22 = vsel %vm3978_vm4, %v952_v1, %v956_v48  ;;  %v962_v23 = vrot.slane %v961_v2, 4  ;;  %v1385_v9 = vshll.u32 %v3319_v52, 16  ;;  %v3808_v2 = vld [vmem:[%s3950_s11 + $0xc8] sm:$0xff]  }
  0x56   : > { %3647 = vmatmul.mubr.msk.bf16.gmra.mxu0 %vm486_vm3, %v3275_v0  ;;  %v1391_v24 = vshll.u32 %v3320_v57, 16  ;;  %v985_v27 = vor.u32 %v984_v4, %v980_v6  ;;  %v990_v28 = vrot.slane %v988_v19, 5  ;;  %v1384_v29 = vrot.slane %v1382_v20, 4  ;;  %v3328_v0 = vld [vmem:[%s3950_s11 + $0xf8] sm:$0xf] }
  0x57   : > { %v976_v26 = vrot.slane %v975_v18, 4  ;;  %v967_v8 = vsel %vm3978_vm4, %v962_v23, %v966_v11  ;;  %v1387_v31 = vrot.slane %v1385_v9, 5  ;;  %v1395_v33 = vshrl.u32 %v3320_v57, 16  ;;  %v3327_v57 = vld [vmem:[%s3950_s11 + $0xec] sm:$0x1] }
  0x58   : > { %v1393_v32 = vrot.slane %v1391_v24, 5  ;;  %v3276_v35 = vcombine.low %v957_v22, %v967_v8  ;;  %v986_v36 = vrot.slane %v985_v27, 4  ;;  %v1401_v37 = vshll.u32 %v3321_v3, 16  ;;  %v3329_v4 = vld [vmem:[%s3950_s11 + $0xfc] sm:$0xf] }
  0x59   : > { %v981_v5 = vsel %vm3978_vm4, %v976_v26, %v980_v6  ;;  %v1388_v40 = vor.u32 %v1387_v31, %v1384_v29  ;;  %v1397_v41 = vrot.slane %v1395_v33, 4  ;;  %v1406_v42 = vshrl.u32 %v3322_v21, 16  ;;  %v3809_v22 = vld [vmem:[%s3950_s11 + $0xdc] sm:$0xff]   ;;  %v3331_v31 = vld [vmem:[%s3950_s11 + $0x10c] sm:$0xf] }
  0x5a   : > { %v1409_v43 = vshll.u32 %v3322_v21, 16  ;;  %3650 = vmatprep.mubr.msk.bf16.mxu0 %vm486_vm3, %v3276_v35  ;;  %v991_v45 = vsel %vm3978_vm4, %v986_v36, %v990_v28  ;;  %v1403_v46 = vrot.slane %v1401_v37, 5  ;;  %v1415_v47 = vshll.u32 %v3323_v34, 16  ;;  %v3330_v26 = vld [vmem:[%s3950_s11 + $0x100] sm:$0x1] }
  0x5b   : > { %v1419_v48 = vshrl.u32 %v3323_v34, 16  ;;  %3633 = vmatmul.mubr.msk.bf16.gmra.mxu1 %vm486_vm3, %v3806_v25  ;;  %v3277_v49 = vcombine.low %v981_v5, %v991_v45  ;;  %v1389_v50 = vrot.slane %v1388_v40, 4  ;;  %v1398_v51 = vor.u32 %v1397_v41, %v1393_v32 }
  0x5c   : > { %v1408_v52 = vrot.slane %v1406_v42, 4  ;;  %3656 = vmatprep.mubr.msk.bf16.mxu1 %vm486_vm3, %v3807_v30  ;;  %v1411_v54 = vrot.slane %v1409_v43, 5  ;;  %v1417_v7 = vrot.slane %v1415_v47, 5  ;;  %v1425_v56 = vshll.u32 %v3324_v38, 16  ;;  %v3333_v43 = vld [vmem:[%s3950_s11 + $0x114] sm:$0x1] }
  0x5d   : > { %v1421_v55 = vrot.slane %v1419_v48, 4  ;;  %v1394_v58 = vsel %vm3978_vm4, %v1389_v50, %v1393_v32  ;;  %v1399_v10 = vrot.slane %v1398_v51, 4  ;;  %v1430_v11 = vshrl.u32 %v3325_v39, 16  ;;  %v3332_v32 = vld [vmem:[%s3950_s11 + $0x110] sm:$0xf] }
  0x5e   : > { %3651 = vmatmul.mubr.msk.bf16.gmra.mxu0 %vm486_vm3, %v3277_v49  ;;  %v1433_v59 = vshll.u32 %v3325_v39, 16  ;;  %v1412_v60 = vor.u32 %v1411_v54, %v1408_v52  ;;  %v1427_v62 = vrot.slane %v1425_v56, 5  ;;  %v1439_v63 = vshll.u32 %v3326_v53, 16  ;;  %v3334_v50 = vld [vmem:[%s3950_s11 + $0x120] sm:$0xf] }
  0x5f   : > { %v1422_v61 = vor.u32 %v1421_v55, %v1417_v7  ;;  %v1404_v1 = vsel %vm3978_vm4, %v1399_v10, %v1403_v46  ;;  %v1432_v6 = vrot.slane %v1430_v11, 4  ;;  %v1443_v18 = vshrl.u32 %v3326_v53, 16  ;;  %v3811_v53 = vld [vmem:[%s3950_s11 + $0x104] sm:$0xff]  }
  0x60   : > { %v1435_v3 = vrot.slane %v1433_v59, 5  ;;  %v3344_v19 = vcombine.low %v1394_v58, %v1404_v1  ;;  %v1413_v20 = vrot.slane %v1412_v60, 4  ;;  %v1441_v23 = vrot.slane %v1439_v63, 5  ;;  %v3336_v59 = vld [vmem:[%s3950_s11 + $0x128] sm:$0x1] }
  0x61   : > { %v1423_v21 = vrot.slane %v1422_v61, 4  ;;  %v1445_v24 = vrot.slane %v1443_v18, 4  ;;  %v1449_v25 = vshll.u32 %v3327_v57, 16  ;;  %v1454_v27 = vshrl.u32 %v3328_v0, 16  ;;  %v3335_v57 = vld [vmem:[%s3950_s11 + $0x124] sm:$0xf] }
  0x62   : > { %v1436_v9 = vor.u32 %v1435_v3, %v1432_v6  ;;  %3674 = vmatprep.mubr.msk.bf16.mxu0 %vm486_vm3, %v3344_v19  ;;  %v1418_v28 = vsel %vm3978_vm4, %v1413_v20, %v1417_v7  ;;  %v1457_v8 = vshll.u32 %v3328_v0, 16  ;;  %v1463_v30 = vshll.u32 %v3329_v4, 16  ;;  %v3337_v0 = vld [vmem:[%s3950_s11 + $0x134] sm:$0xf] }
  0x63   : > { %v1428_v29 = vsel %vm3978_vm4, %v1423_v21, %v1427_v62  ;;  %3657 = vmatmul.mubr.msk.bf16.vlgmr.msra.gmra.mxu1 %vm486_vm3, %v3808_v2  ;;  %v1446_v35 = vor.u32 %v1445_v24, %v1441_v23  ;;  %v1451_v5 = vrot.slane %v1449_v25, 5  ;;  %v1456_v36 = vrot.slane %v1454_v27, 4  ;;  %v3338_v21 = vld [vmem:[%s3950_s11 + $0x138] sm:$0xf]  ;;  %v3339_v25 = vld [vmem:[%s3950_s11 + $0x13c] sm:$0x1] }
  0x64   : > { %v3345_v33 = vcombine.low %v1418_v28, %v1428_v29  ;;  %v1437_v34 = vrot.slane %v1436_v9, 4  ;;  %3691 = vmatpush3.bf16.msra.mxu1 %v3954_v14  ;;  %3660 = vmatprep.mubr.msk.bf16.mxu1 %vm486_vm3, %v3809_v22  ;;  %v1459_v37 = vrot.slane %v1457_v8, 5  ;;  %v1465_v38 = vrot.slane %v1463_v30, 5  ;;  %v3810_v14 = vld [vmem:[%s3950_s11 + $0xf0] sm:$0xff]   ;;  %v3340_v8 = vld [vmem:[%s3950_s11 + $0x148] sm:$0xf] }
  0x65   : > { %v1467_v39 = vshrl.u32 %v3329_v4, 16  ;;  %v1447_v41 = vrot.slane %v1446_v35, 4  ;;  %v1473_v42 = vshll.u32 %v3330_v26, 16  ;;  %v1478_v45 = vshrl.u32 %v3331_v31, 16  ;;  %3772 = vmatprep.subr.msk.bf16.mxu1 %vm511_vm0, %v3940_v12 }
  0x66   : > { %3675 = vmatmul.mubr.msk.bf16.vlgmr.msra.gmra.mxu0 %vm486_vm3, %v3345_v33  ;;  %v1442_v40 = vsel %vm3978_vm4, %v1437_v34, %v1441_v23  ;;  %v1460_v46 = vor.u32 %v1459_v37, %v1456_v36  ;;  %v1481_v48 = vshll.u32 %v3331_v31, 16  ;;  %v1487_v49 = vshll.u32 %v3332_v32, 16  ;;  %v3812_v31 = vld [vmem:[%s3950_s11 + $0x118] sm:$0xff]   ;;  %v3813_v37 = vld [vmem:[%s3950_s11 + $0x12c] sm:$0xff]  }
  0x67   : > { %3709 = vmatpush3.bf16.msra.mxu0 %v3958_v15  ;;  %v1469_v47 = vrot.slane %v1467_v39, 4  ;;  %v1452_v51 = vsel %vm3978_vm4, %v1447_v41, %v1451_v5  ;;  %v1475_v52 = vrot.slane %v1473_v42, 5  ;;  %v1480_v54 = vrot.slane %v1478_v45, 4  ;;  %v3341_v39 = vld [vmem:[%s3950_s11 + $0x14c] sm:$0xf] }
  0x68   : > { %v1491_v7 = vshrl.u32 %v3332_v32, 16  ;;  %3773 = vmatprep.subr.msk.bf16.mxu0 %vm511_vm0, %v3945_v13  ;;  %v3346_v12 = vcombine.low %v1442_v40, %v1452_v51  ;;  %v1461_v15 = vrot.slane %v1460_v46, 4  ;;  %v1483_v56 = vrot.slane %v1481_v48, 5  ;;  %v3342_v45 = vld [vmem:[%s3950_s11 + $0x150] sm:$0x1] }
  0x69   : > { %v1470_v55 = vor.u32 %v1469_v47, %v1465_v38  ;;  %v1489_v58 = vrot.slane %v1487_v49, 5  ;;  %v1497_v11 = vshll.u32 %v3333_v43, 16  ;;  %v1502_v60 = vshrl.u32 %v3334_v50, 16 }
  0x6a   : > { %v1493_v10 = vrot.slane %v1491_v7, 4  ;;  %3678 = vmatprep.mubr.msk.bf16.mxu0 %vm486_vm3, %v3346_v12  ;;  %v1466_v61 = vsel %vm3978_vm4, %v1461_v15, %v1465_v38  ;;  %v1484_v63 = vor.u32 %v1483_v56, %v1480_v54  ;;  %v1505_v13 = vshll.u32 %v3334_v50, 16 }
  0x6b   : > { %v1471_v62 = vrot.slane %v1470_v55, 4  ;;  %3661 = vmatmul.mubr.msk.bf16.gmra.mxu1 %vm486_vm3, %v3810_v14  ;;  %v1499_v2 = vrot.slane %v1497_v11, 5  ;;  %v1504_v6 = vrot.slane %v1502_v60, 4  ;;  %v1511_v3 = vshll.u32 %v3335_v57, 16  ;;  %v3360_v14 = vld [vmem:[%s3950_s11 + $0xb4] sm:$0xf] }
  0x6c   : > { %v1494_v1 = vor.u32 %v1493_v10, %v1489_v58  ;;  %3664 = vmatprep.mubr.msk.bf16.mxu1 %vm486_vm3, %v3811_v53  ;;  %v1485_v4 = vrot.slane %v1484_v63, 4  ;;  %v1507_v19 = vrot.slane %v1505_v13, 5  ;;  %v1515_v20 = vshrl.u32 %v3335_v57, 16  ;;  %v3361_v55 = vld [vmem:[%s3950_s11 + $0xb8] sm:$0xf] }
  0x6d   : > { %v1476_v18 = vsel %vm3978_vm4, %v1471_v62, %v1475_v52  ;;  %v1513_v9 = vrot.slane %v1511_v3, 5  ;;  %v1521_v24 = vshll.u32 %v3336_v59, 16  ;;  %v1526_v29 = vshrl.u32 %v3337_v0, 16  ;;  %v3362_v11 = vld [vmem:[%s3950_s11 + $0xbc] sm:$0x1] }
  0x6e   : > { %v3347_v22 = vcombine.low %v1466_v61, %v1476_v18  ;;  %v1495_v23 = vrot.slane %v1494_v1, 4  ;;  %v1490_v26 = vsel %vm3978_vm4, %v1485_v4, %v1489_v58  ;;  %v1508_v27 = vor.u32 %v1507_v19, %v1504_v6  ;;  %v3363_v19 = vld [vmem:[%s3950_s11 + $0xc8] sm:$0xf] }
  0x6f   : > { %v1517_v28 = vrot.slane %v1515_v20, 4  ;;  %v1523_v32 = vrot.slane %v1521_v24, 5  ;;  %v1529_v33 = vshll.u32 %v3337_v0, 16  ;;  %v1535_v34 = vshll.u32 %v3338_v21, 16  ;;  %v3814_v0 = vld [vmem:[%s3950_s11 + $0x140] sm:$0xff]  }
  0x70   : > { %3679 = vmatmul.mubr.msk.bf16.gmra.mxu0 %vm486_vm3, %v3347_v22  ;;  %v1500_v30 = vsel %vm3978_vm4, %v1495_v23, %v1499_v2  ;;  %v1509_v5 = vrot.slane %v1508_v27, 4  ;;  %v1528_v38 = vrot.slane %v1526_v29, 4  ;;  %v1539_v42 = vshrl.u32 %v3338_v21, 16 }
  0x71   : > { %v3348_v35 = vcombine.low %v1490_v26, %v1500_v30  ;;  %v1518_v36 = vor.u32 %v1517_v28, %v1513_v9  ;;  %v1531_v40 = vrot.slane %v1529_v33, 5  ;;  %v1537_v41 = vrot.slane %v1535_v34, 5  ;;  %v3365_v28 = vld [vmem:[%s3950_s11 + $0xd0] sm:$0x1]  ;;  %v3815_v34 = vld [vmem:[%s3950_s11 + $0x14] sm:$0xff]  }
  0x72   : > { %v1545_v43 = vshll.u32 %v3339_v25, 16  ;;  %v1514_v46 = vsel %vm3978_vm4, %v1509_v5, %v1513_v9  ;;  %v1550_v48 = vshrl.u32 %v3340_v8, 16  ;;  %v1553_v49 = vshll.u32 %v3340_v8, 16  ;;  %v3364_v9 = vld [vmem:[%s3950_s11 + $0xcc] sm:$0xf] }
  0x73   : > { %3682 = vmatprep.mubr.msk.bf16.mxu0 %vm486_vm3, %v3348_v35  ;;  %v1519_v47 = vrot.slane %v1518_v36, 4  ;;  %3665 = vmatmul.mubr.msk.bf16.gmra.mxu1 %vm486_vm3, %v3812_v31  ;;  %v1532_v50 = vor.u32 %v1531_v40, %v1528_v38  ;;  %v1541_v51 = vrot.slane %v1539_v42, 4  ;;  %v1559_v53 = vshll.u32 %v3341_v39, 16  ;;  %v3366_v36 = vld [vmem:[%s3950_s11 + $0xdc] sm:$0xf] }
  0x74   : > { %v1547_v52 = vrot.slane %v1545_v43, 5  ;;  %3668 = vmatprep.mubr.msk.bf16.mxu1 %vm486_vm3, %v3813_v37  ;;  %v1552_v7 = vrot.slane %v1550_v48, 4  ;;  %v1555_v12 = vrot.slane %v1553_v49, 5  ;;  %v1563_v15 = vshrl.u32 %v3341_v39, 16 }
  0x75   : > { %v1524_v54 = vsel %vm3978_vm4, %v1519_v47, %v1523_v32  ;;  %v1533_v57 = vrot.slane %v1532_v50, 4  ;;  %v1542_v58 = vor.u32 %v1541_v51, %v1537_v41  ;;  %v1561_v10 = vrot.slane %v1559_v53, 5  ;;  %v3368_v53 = vld [vmem:[%s3950_s11 + $0xe4] sm:$0x1] }
  0x76   : > { %v3349_v56 = vcombine.low %v1514_v46, %v1524_v54  ;;  %v1556_v59 = vor.u32 %v1555_v12, %v1552_v7  ;;  %v1565_v60 = vrot.slane %v1563_v15, 4  ;;  %v1569_v61 = vshll.u32 %v3342_v45, 16  ;;  %v3369_v7 = vld [vmem:[%s3950_s11 + $0xf0] sm:$0xf] }
  0x77   : > { %v1764_v62 = vshrl.u32 %v3360_v14, 16  ;;  %v1538_v63 = vsel %vm3978_vm4, %v1533_v57, %v1537_v41  ;;  %v1543_v13 = vrot.slane %v1542_v58, 4  ;;  %v1767_v1 = vshll.u32 %v3360_v14, 16  ;;  %v3367_v41 = vld [vmem:[%s3950_s11 + $0xe0] sm:$0xf] }
  0x78   : > { %3683 = vmatmul.mubr.msk.bf16.gmra.mxu0 %vm486_vm3, %v3349_v56  ;;  %v1773_v2 = vshll.u32 %v3361_v55, 16  ;;  %v1557_v6 = vrot.slane %v1556_v59, 4  ;;  %v1566_v3 = vor.u32 %v1565_v60, %v1561_v10  ;;  %v1571_v18 = vrot.slane %v1569_v61, 5  ;;  %v3370_v57 = vld [vmem:[%s3950_s11 + $0xf4] sm:$0xf]  ;;  %v3816_v60 = vld [vmem:[%s3950_s11 + $0x28] sm:$0xff]  }
  0x79   : > { %v1766_v4 = vrot.slane %v1764_v62, 4  ;;  %v1548_v20 = vsel %vm3978_vm4, %v1543_v13, %v1547_v52  ;;  %v1769_v21 = vrot.slane %v1767_v1, 5  ;;  %v1777_v23 = vshrl.u32 %v3361_v55, 16 }
  0x7a   : > { %v1775_v22 = vrot.slane %v1773_v2, 5  ;;  %v3350_v24 = vcombine.low %v1538_v63, %v1548_v20  ;;  %v1562_v25 = vsel %vm3978_vm4, %v1557_v6, %v1561_v10  ;;  %v1567_v26 = vrot.slane %v1566_v3, 4  ;;  %v3371_v2 = vld [vmem:[%s3950_s11 + $0xf8] sm:$0x1] }
  0x7b   : > { %v1783_v27 = vshll.u32 %v3362_v11, 16  ;;  %3669 = vmatmul.mubr.msk.bf16.gmra.mxu1 %vm486_vm3, %v3814_v0  ;;  %v1770_v29 = vor.u32 %v1769_v21, %v1766_v4  ;;  %v1779_v8 = vrot.slane %v1777_v23, 4  ;;  %v1788_v30 = vshrl.u32 %v3363_v19, 16  ;;  %v3373_v23 = vld [vmem:[%s3950_s11 + $0x108] sm:$0xf] }
  0x7c   : > { %v1791_v31 = vshll.u32 %v3363_v19, 16  ;;  %3686 = vmatprep.mubr.msk.bf16.mxu0 %vm486_vm3, %v3350_v24  ;;  %v1572_v32 = vsel %vm3978_vm4, %v1567_v26, %v1571_v18  ;;  %v1797_v35 = vshll.u32 %v3364_v9, 16  ;;  %v1801_v5 = vshrl.u32 %v3364_v9, 16  ;;  %v3372_v18 = vld [vmem:[%s3950_s11 + $0x104] sm:$0xf] }
  0x7d   : > { %v1785_v33 = vrot.slane %v1783_v27, 5  ;;  %v3351_v37 = vcombine.low %v1562_v25, %v1572_v32  ;;  %v1771_v38 = vrot.slane %v1770_v29, 4  ;;  %v1780_v39 = vor.u32 %v1779_v8, %v1775_v22  ;;  %v3374_v8 = vld [vmem:[%s3950_s11 + $0x10c] sm:$0x1] }
  0x7e   : > { %v1790_v40 = vrot.slane %v1788_v30, 4  ;;  %v1793_v42 = vrot.slane %v1791_v31, 5  ;;  %v1799_v43 = vrot.slane %v1797_v35, 5  ;;  %v1803_v45 = vrot.slane %v1801_v5, 4  ;;  %v3375_v35 = vld [vmem:[%s3950_s11 + $0x118] sm:$0xf] }
  0x7f   : > { %v1807_v14 = vshll.u32 %v3365_v28, 16  ;;  %v1776_v46 = vsel %vm3978_vm4, %v1771_v38, %v1775_v22  ;;  %v1781_v47 = vrot.slane %v1780_v39, 4  ;;  %v1812_v48 = vshrl.u32 %v3366_v36, 16  ;;  %v3817_v22 = vld [vmem:[%s3950_s11 + $0x3c] sm:$0xff]  }
  0x80   : > { %3687 = vmatmul.mubr.msk.bf16.gmra.mxu0 %vm486_vm3, %v3351_v37  ;;  %v1815_v49 = vshll.u32 %v3366_v36, 16  ;;  %v1794_v50 = vor.u32 %v1793_v42, %v1790_v40  ;;  %v1804_v51 = vor.u32 %v1803_v45, %v1799_v43  ;;  %v1821_v54 = vshll.u32 %v3367_v41, 16  ;;  %v3818_v42 = vld [vmem:[%s3950_s11 + $0x50] sm:$0xff]  }
  0x81   : > { %3710 = vmatprep.mubr.msk.bf16.mxu0 %vm486_vm3, %v3815_v34  ;;  %v1809_v52 = vrot.slane %v1807_v14, 5  ;;  %v1786_v12 = vsel %vm3978_vm4, %v1781_v47, %v1785_v33  ;;  %v1814_v15 = vrot.slane %v1812_v48, 4  ;;  %v1825_v56 = vshrl.u32 %v3367_v41, 16  ;;  %v3376_v41 = vld [vmem:[%s3950_s11 + $0x11c] sm:$0xf] }
  0x82   : > { %v1817_v55 = vrot.slane %v1815_v49, 5  ;;  %v3385_v58 = vcombine.low %v1776_v46, %v1786_v12  ;;  %v1795_v10 = vrot.slane %v1794_v50, 4  ;;  %v1805_v11 = vrot.slane %v1804_v51, 4  ;;  %v3819_v50 = vld [vmem:[%s3950_s11 + $0x64] sm:$0xff]   ;;  %v3377_v51 = vld [vmem:[%s3950_s11 + $0x120] sm:$0x1] }
  0x83   : > { %v1823_v59 = vrot.slane %v1821_v54, 5  ;;  %v1827_v62 = vrot.slane %v1825_v56, 4  ;;  %v1831_v63 = vshll.u32 %v3368_v53, 16  ;;  %v1836_v13 = vshrl.u32 %v3369_v7, 16 }
  0x84   : > { %v1818_v61 = vor.u32 %v1817_v55, %v1814_v15  ;;  %3692 = vmatprep.mubr.msk.bf16.mxu1 %vm486_vm3, %v3385_v58  ;;  %v1800_v0 = vsel %vm3978_vm4, %v1795_v10, %v1799_v43  ;;  %v1810_v1 = vsel %vm3978_vm4, %v1805_v11, %v1809_v52  ;;  %v1839_v6 = vshll.u32 %v3369_v7, 16  ;;  %v3378_v15 = vld [vmem:[%s3950_s11 + $0x12c] sm:$0xf]  ;;  %v3379_v10 = vld [vmem:[%s3950_s11 + $0x130] sm:$0xf] }
  0x85   : > { %v1845_v3 = vshll.u32 %v3370_v57, 16  ;;  %v3386_v4 = vcombine.low %v1800_v0, %v1810_v1  ;;  %v1828_v20 = vor.u32 %v1827_v62, %v1823_v59  ;;  %v1833_v21 = vrot.slane %v1831_v63, 5  ;;  %v3380_v0 = vld [vmem:[%s3950_s11 + $0x134] sm:$0x1] }
  0x86   : > { %v1819_v19 = vrot.slane %v1818_v61, 4  ;;  %v1838_v9 = vrot.slane %v1836_v13, 4  ;;  %v1841_v24 = vrot.slane %v1839_v6, 5  ;;  %v1849_v26 = vshrl.u32 %v3370_v57, 16 }
  0x87   : > { %v1847_v25 = vrot.slane %v1845_v3, 5  ;;  %3693 = vmatmul.mubr.msk.bf16.vlgmr.msra.gmra.mxu1 %vm486_vm3, %v3386_v4  ;;  %v1829_v28 = vrot.slane %v1828_v20, 4  ;;  %v1855_v29 = vshll.u32 %v3371_v2, 16  ;;  %v1860_v30 = vshrl.u32 %v3372_v18, 16  ;;  %v3381_v4 = vld [vmem:[%s3950_s11 + $0x140] sm:$0xf] }
  0x88   : > { %3711 = vmatmul.mubr.msk.bf16.vlgmr.msra.gmra.mxu0 %vm486_vm3, %v3816_v60  ;;  %v1824_v27 = vsel %vm3978_vm4, %v1819_v19, %v1823_v59  ;;  %3727 = vmatpush3.bf16.msra.mxu1 %v3962_v16  ;;  %v1842_v31 = vor.u32 %v1841_v24, %v1838_v9  ;;  %v1851_v32 = vrot.slane %v1849_v26, 4  ;;  %v1863_v33 = vshll.u32 %v3372_v18, 16  ;;  %v3820_v9 = vld [vmem:[%s3950_s11 + $0x78] sm:$0xff]  }
  0x89   : > { %3745 = vmatpush3.bf16.msra.mxu0 %v3966_v17  ;;  %v1869_v34 = vshll.u32 %v3373_v23, 16  ;;  %v1834_v5 = vsel %vm3978_vm4, %v1829_v28, %v1833_v21  ;;  %3714 = vmatprep.mubr.msk.bf16.mxu0 %vm486_vm3, %v3817_v22  ;;  %v1857_v36 = vrot.slane %v1855_v29, 5  ;;  %v1862_v37 = vrot.slane %v1860_v30, 4  ;;  %v3383_v30 = vld [vmem:[%s3950_s11 + $0x148] sm:$0x1] }
  0x8a   : > { %v1873_v38 = vshrl.u32 %v3373_v23, 16  ;;  %v3387_v16 = vcombine.low %v1824_v27, %v1834_v5  ;;  %v1843_v39 = vrot.slane %v1842_v31, 4  ;;  %v1852_v40 = vor.u32 %v1851_v32, %v1847_v25  ;;  %v3382_v23 = vld [vmem:[%s3950_s11 + $0x144] sm:$0xf] }
  0x8b   : > { %v1865_v17 = vrot.slane %v1863_v33, 5  ;;  %v1871_v43 = vrot.slane %v1869_v34, 5  ;;  %v1879_v14 = vshll.u32 %v3374_v8, 16  ;;  %v1884_v46 = vshrl.u32 %v3375_v35, 16  ;;  %v3821_v8 = vld [vmem:[%s3950_s11 + $0x8c] sm:$0xff]  }
  0x8c   : > { %v1875_v45 = vrot.slane %v1873_v38, 4  ;;  %3696 = vmatprep.mubr.msk.bf16.mxu1 %vm486_vm3, %v3387_v16  ;;  %v1848_v47 = vsel %vm3978_vm4, %v1843_v39, %v1847_v25  ;;  %v1853_v48 = vrot.slane %v1852_v40, 4  ;;  %v1887_v52 = vshll.u32 %v3375_v35, 16  ;;  %v3435_v40 = vld [vmem:[%s3950_s11 + $0x20] sm:$0xf] }
  0x8d   : > { %v1866_v49 = vor.u32 %v1865_v17, %v1862_v37  ;;  %v1881_v54 = vrot.slane %v1879_v14, 5  ;;  %v1886_v7 = vrot.slane %v1884_v46, 4  ;;  %v1893_v12 = vshll.u32 %v3376_v41, 16 }
  0x8e   : > { %v1876_v53 = vor.u32 %v1875_v45, %v1871_v43  ;;  %v1858_v55 = vsel %vm3978_vm4, %v1853_v48, %v1857_v36  ;;  %v1889_v57 = vrot.slane %v1887_v52, 5  ;;  %v1897_v58 = vshrl.u32 %v3376_v41, 16  ;;  %v3434_v36 = vld [vmem:[%s3950_s11 + $0x1c] sm:$0xf] }
  0x8f   : > { %v1867_v56 = vrot.slane %v1866_v49, 4  ;;  %v3388_v11 = vcombine.low %v1848_v47, %v1858_v55  ;;  %v1895_v60 = vrot.slane %v1893_v12, 5  ;;  %v1903_v61 = vshll.u32 %v3377_v51, 16 }
  0x90   : > { %3715 = vmatmul.mubr.msk.bf16.gmra.mxu0 %vm486_vm3, %v3818_v42  ;;  %v1877_v59 = vrot.slane %v1876_v53, 4  ;;  %v1890_v63 = vor.u32 %v1889_v57, %v1886_v7  ;;  %v1899_v13 = vrot.slane %v1897_v58, 4  ;;  %v1908_v1 = vshrl.u32 %v3378_v15, 16 }
  0x91   : > { %v1872_v62 = vsel %vm3978_vm4, %v1867_v56, %v1871_v43  ;;  %3718 = vmatprep.mubr.msk.bf16.mxu0 %vm486_vm3, %v3819_v50  ;;  %3697 = vmatmul.mubr.msk.bf16.gmra.mxu1 %vm486_vm3, %v3388_v11  ;;  %v1905_v6 = vrot.slane %v1903_v61, 5  ;;  %v1911_v3 = vshll.u32 %v3378_v15, 16  ;;  %v1917_v18 = vshll.u32 %v3379_v10, 16  ;;  %v3436_v50 = vld [vmem:[%s3950_s11 + $0x24] sm:$0x1] }
  0x92   : > { %v1882_v2 = vsel %vm3978_vm4, %v1877_v59, %v1881_v54  ;;  %v1891_v20 = vrot.slane %v1890_v63, 4  ;;  %v1900_v21 = vor.u32 %v1899_v13, %v1895_v60  ;;  %v1910_v22 = vrot.slane %v1908_v1, 4  ;;  %v3475_v15 = vld [vmem:[%s3950_s11 + $0x14] sm:$0xf]  ;;  %v3822_v56 = vld [vmem:[%s3950_s11 + $0xa0] sm:$0xff]  }
  0x93   : > { %v3389_v19 = vcombine.low %v1872_v62, %v1882_v2  ;;  %v1913_v24 = vrot.slane %v1911_v3, 5  ;;  %v1919_v25 = vrot.slane %v1917_v18, 5  ;;  %v1921_v26 = vshrl.u32 %v3379_v10, 16  ;;  %v3476_v11 = vld [vmem:[%s3950_s11 + $0x18] sm:$0xf] }
  0x94   : > { %v1927_v27 = vshll.u32 %v3380_v0, 16  ;;  %v1896_v28 = vsel %vm3978_vm4, %v1891_v20, %v1895_v60  ;;  %v1901_v29 = vrot.slane %v1900_v21, 4  ;;  %v1932_v31 = vshrl.u32 %v3381_v4, 16  ;;  %v3477_v0 = vld [vmem:[%s3950_s11 + $0x1c] sm:$0x1] }
  0x95   : > { %3700 = vmatprep.mubr.msk.bf16.mxu1 %vm486_vm3, %v3389_v19  ;;  %v1935_v32 = vshll.u32 %v3381_v4, 16  ;;  %v1914_v33 = vor.u32 %v1913_v24, %v1910_v22  ;;  %v1923_v34 = vrot.slane %v1921_v26, 4  ;;  %v1941_v5 = vshll.u32 %v3382_v23, 16  ;;  %v3437_v19 = vld [vmem:[%s3950_s11 + $0x30] sm:$0xf] }
  0x96   : > { %v1929_v35 = vrot.slane %v1927_v27, 5  ;;  %v1906_v37 = vsel %vm3978_vm4, %v1901_v29, %v1905_v6  ;;  %v1934_v38 = vrot.slane %v1932_v31, 4  ;;  %v1945_v39 = vshrl.u32 %v3382_v23, 16 }
  0x97   : > { %v1937_v16 = vrot.slane %v1935_v32, 5  ;;  %v3390_v17 = vcombine.low %v1896_v28, %v1906_v37  ;;  %v1915_v41 = vrot.slane %v1914_v33, 4  ;;  %v1924_v42 = vor.u32 %v1923_v34, %v1919_v25  ;;  %v3439_v34 = vld [vmem:[%s3950_s11 + $0x38] sm:$0x1] }
  0x98   : > { %3719 = vmatmul.mubr.msk.bf16.gmra.mxu0 %vm486_vm3, %v3820_v9  ;;  %v1943_v43 = vrot.slane %v1941_v5, 5  ;;  %v1947_v14 = vrot.slane %v1945_v39, 4  ;;  %v1951_v46 = vshll.u32 %v3383_v30, 16  ;;  %v2345_v47 = vshrl.u32 %v3434_v36, 16  ;;  %v3438_v9 = vld [vmem:[%s3950_s11 + $0x34] sm:$0xf] }
  0x99   : > { %3722 = vmatprep.mubr.msk.bf16.mxu0 %vm486_vm3, %v3821_v8  ;;  %v1938_v45 = vor.u32 %v1937_v16, %v1934_v38  ;;  %3701 = vmatmul.mubr.msk.bf16.gmra.mxu1 %vm486_vm3, %v3390_v17  ;;  %v1920_v48 = vsel %vm3978_vm4, %v1915_v41, %v1919_v25  ;;  %v1925_v49 = vrot.slane %v1924_v42, 4  ;;  %v2348_v51 = vshll.u32 %v3434_v36, 16  ;;  %v3478_v5 = vld [vmem:[%s3950_s11 + $0x28] sm:$0xf]  ;;  %v3479_v39 = vld [vmem:[%s3950_s11 + $0x2c] sm:$0xf] }
  0x9a   : > { %v2354_v52 = vshll.u32 %v3435_v40, 16  ;;  %v1948_v54 = vor.u32 %v1947_v14, %v1943_v43  ;;  %v1953_v7 = vrot.slane %v1951_v46, 5  ;;  %v2347_v12 = vrot.slane %v2345_v47, 4 }
  0x9b   : > { %v1939_v53 = vrot.slane %v1938_v45, 4  ;;  %v1930_v55 = vsel %vm3978_vm4, %v1925_v49, %v1929_v35  ;;  %v2350_v57 = vrot.slane %v2348_v51, 5  ;;  %v2358_v10 = vshrl.u32 %v3435_v40, 16  ;;  %v3480_v49 = vld [vmem:[%s3950_s11 + $0x30] sm:$0x1] }
  0x9c   : > { %v2356_v58 = vrot.slane %v2354_v52, 5  ;;  %v3391_v59 = vcombine.low %v1920_v48, %v1930_v55  ;;  %v1949_v61 = vrot.slane %v1948_v54, 4  ;;  %v2364_v62 = vshll.u32 %v3436_v50, 16  ;;  %v3440_v52 = vld [vmem:[%s3950_s11 + $0x44] sm:$0xf] }
  0x9d   : > { %v1944_v60 = vsel %vm3978_vm4, %v1939_v53, %v1943_v43  ;;  %v2351_v63 = vor.u32 %v2350_v57, %v2347_v12  ;;  %v2360_v13 = vrot.slane %v2358_v10, 4  ;;  %v2727_v1 = vshrl.u32 %v3475_v15, 16 }
  0x9e   : > { %v2730_v2 = vshll.u32 %v3475_v15, 16  ;;  %3704 = vmatprep.mubr.msk.bf16.mxu1 %vm486_vm3, %v3391_v59  ;;  %v1954_v6 = vsel %vm3978_vm4, %v1949_v61, %v1953_v7  ;;  %v2366_v3 = vrot.slane %v2364_v62, 5  ;;  %v2736_v18 = vshll.u32 %v3476_v11, 16  ;;  %v3441_v15 = vld [vmem:[%s3950_s11 + $0x48] sm:$0xf] }
  0x9f   : > { %v2740_v4 = vshrl.u32 %v3476_v11, 16  ;;  %v3392_v20 = vcombine.low %v1944_v60, %v1954_v6  ;;  %v2352_v21 = vrot.slane %v2351_v63, 4  ;;  %v2361_v22 = vor.u32 %v2360_v13, %v2356_v58  ;;  %v3442_v60 = vld [vmem:[%s3950_s11 + $0x4c] sm:$0x1] }
  0xa0   : > { %3723 = vmatmul.mubr.msk.bf16.gmra.mxu0 %vm486_vm3, %v3822_v56  ;;  %v2729_v23 = vrot.slane %v2727_v1, 4  ;;  %v2732_v24 = vrot.slane %v2730_v2, 5  ;;  %v2738_v25 = vrot.slane %v2736_v18, 5  ;;  %v2746_v27 = vshll.u32 %v3477_v0, 16  ;;  %v3481_v1 = vld [vmem:[%s3950_s11 + $0x3c] sm:$0xf] }
  0xa1   : > { %v2742_v26 = vrot.slane %v2740_v4, 4  ;;  %3705 = vmatmul.mubr.msk.bf16.gmra.mxu1 %vm486_vm3, %v3392_v20  ;;  %v2357_v28 = vsel %vm3978_vm4, %v2352_v21, %v2356_v58  ;;  %v2362_v29 = vrot.slane %v2361_v22, 4  ;;  %v2369_v8 = vshrl.u32 %v3437_v19, 16  ;;  %v3482_v22 = vld [vmem:[%s3950_s11 + $0x40] sm:$0xf] }
  0xa2   : > { %v2372_v30 = vshll.u32 %v3437_v19, 16  ;;  %v2733_v31 = vor.u32 %v2732_v24, %v2729_v23  ;;  %v2748_v33 = vrot.slane %v2746_v27, 5  ;;  %v2378_v35 = vshll.u32 %v3438_v9, 16 }
  0xa3   : > { %v2743_v32 = vor.u32 %v2742_v26, %v2738_v25  ;;  %v2367_v36 = vsel %vm3978_vm4, %v2362_v29, %v2366_v3  ;;  %v2371_v37 = vrot.slane %v2369_v8, 4  ;;  %v2382_v16 = vshrl.u32 %v3438_v9, 16  ;;  %v3483_v29 = vld [vmem:[%s3950_s11 + $0x44] sm:$0x1] }
  0xa4   : > { %v2374_v38 = vrot.slane %v2372_v30, 5  ;;  %v3459_v40 = vcombine.low %v2357_v28, %v2367_v36  ;;  %v2734_v17 = vrot.slane %v2733_v31, 4  ;;  %v2380_v42 = vrot.slane %v2378_v35, 5 }
  0xa5   : > { %v2744_v41 = vrot.slane %v2743_v32, 4  ;;  %v2384_v45 = vrot.slane %v2382_v16, 4  ;;  %v2388_v14 = vshll.u32 %v3439_v34, 16  ;;  %v2751_v46 = vshrl.u32 %v3478_v5, 16  ;;  %v3443_v34 = vld [vmem:[%s3950_s11 + $0x58] sm:$0xf] }
  0xa6   : > { %v2375_v43 = vor.u32 %v2374_v38, %v2371_v37  ;;  %3728 = vmatprep.mubr.msk.bf16.mxu1 %vm486_vm3, %v3459_v40  ;;  %v2739_v47 = vsel %vm3978_vm4, %v2734_v17, %v2738_v25  ;;  %v2754_v50 = vshll.u32 %v3478_v5, 16  ;;  %v2760_v51 = vshll.u32 %v3479_v39, 16  ;;  %v3444_v38 = vld [vmem:[%s3950_s11 + $0x5c] sm:$0xf] }
  0xa7   : > { %v2749_v48 = vsel %vm3978_vm4, %v2744_v41, %v2748_v33  ;;  %v2385_v7 = vor.u32 %v2384_v45, %v2380_v42  ;;  %v2390_v12 = vrot.slane %v2388_v14, 5  ;;  %v2753_v55 = vrot.slane %v2751_v46, 4  ;;  %v3445_v45 = vld [vmem:[%s3950_s11 + $0x60] sm:$0x1] }
  0xa8   : > { %v3500_v53 = vcombine.low %v2739_v47, %v2749_v48  ;;  %v2376_v54 = vrot.slane %v2375_v43, 4  ;;  %v2756_v56 = vrot.slane %v2754_v50, 5  ;;  %v2762_v57 = vrot.slane %v2760_v51, 5  ;;  %v3484_v50 = vld [vmem:[%s3950_s11 + $0x50] sm:$0xf] }
  0xa9   : > { %v2764_v58 = vshrl.u32 %v3479_v39, 16  ;;  %v2386_v11 = vrot.slane %v2385_v7, 4  ;;  %v2770_v59 = vshll.u32 %v3480_v49, 16  ;;  %v2393_v61 = vshrl.u32 %v3440_v52, 16  ;;  %v3485_v7 = vld [vmem:[%s3950_s11 + $0x54] sm:$0xf] }
  0xaa   : > { %3746 = vmatprep.mubr.msk.bf16.mxu0 %vm486_vm3, %v3500_v53  ;;  %v2381_v10 = vsel %vm3978_vm4, %v2376_v54, %v2380_v42  ;;  %v2757_v62 = vor.u32 %v2756_v56, %v2753_v55  ;;  %v2396_v13 = vshll.u32 %v3440_v52, 16  ;;  %v2402_v0 = vshll.u32 %v3441_v15, 16 }
  0xab   : > { %v2766_v63 = vrot.slane %v2764_v58, 4  ;;  %v2391_v2 = vsel %vm3978_vm4, %v2386_v11, %v2390_v12  ;;  %v2772_v6 = vrot.slane %v2770_v59, 5  ;;  %v2395_v3 = vrot.slane %v2393_v61, 4 }
  0xac   : > { %v2406_v18 = vshrl.u32 %v3441_v15, 16  ;;  %v3460_v4 = vcombine.low %v2381_v10, %v2391_v2  ;;  %v2758_v19 = vrot.slane %v2757_v62, 4  ;;  %v2398_v21 = vrot.slane %v2396_v13, 5  ;;  %v3486_v10 = vld [vmem:[%s3950_s11 + $0x58] sm:$0x1] }
  0xad   : > { %v2767_v20 = vor.u32 %v2766_v63, %v2762_v57  ;;  %v2404_v23 = vrot.slane %v2402_v0, 5  ;;  %v2412_v24 = vshll.u32 %v3442_v60, 16  ;;  %v2775_v25 = vshrl.u32 %v3481_v1, 16  ;;  %v3446_v13 = vld [vmem:[%s3950_s11 + $0x6c] sm:$0xf] }
  0xae   : > { %v2408_v9 = vrot.slane %v2406_v18, 4  ;;  %3729 = vmatmul.mubr.msk.bf16.vlgmr.msra.gmra.mxu1 %vm486_vm3, %v3460_v4  ;;  %v2763_v26 = vsel %vm3978_vm4, %v2758_v19, %v2762_v57  ;;  %v2399_v28 = vor.u32 %v2398_v21, %v2395_v3  ;;  %v2778_v8 = vshll.u32 %v3481_v1, 16  ;;  %v3447_v3 = vld [vmem:[%s3950_s11 + $0x70] sm:$0xf] }
  0xaf   : > { %v2768_v27 = vrot.slane %v2767_v20, 4  ;;  %v2414_v31 = vrot.slane %v2412_v24, 5  ;;  %v2777_v32 = vrot.slane %v2775_v25, 4  ;;  %v2784_v33 = vshll.u32 %v3482_v22, 16 }
  0xb0   : > { %v2409_v30 = vor.u32 %v2408_v9, %v2404_v23  ;;  %v2400_v5 = vrot.slane %v2399_v28, 4  ;;  %v2780_v36 = vrot.slane %v2778_v8, 5  ;;  %v2788_v37 = vshrl.u32 %v3482_v22, 16 }
  0xb1   : > { %v2773_v35 = vsel %vm3978_vm4, %v2768_v27, %v2772_v6  ;;  %v2786_v40 = vrot.slane %v2784_v33, 5  ;;  %v2794_v17 = vshll.u32 %v3483_v29, 16  ;;  %v2417_v14 = vshrl.u32 %v3443_v34, 16 }
  0xb2   : > { %v3501_v16 = vcombine.low %v2763_v26, %v2773_v35  ;;  %v2410_v39 = vrot.slane %v2409_v30, 4  ;;  %v2405_v41 = vsel %vm3978_vm4, %v2400_v5, %v2404_v23  ;;  %v2781_v42 = vor.u32 %v2780_v36, %v2777_v32  ;;  %v3448_v26 = vld [vmem:[%s3950_s11 + $0x74] sm:$0x1]  ;;  %v3487_v32 = vld [vmem:[%s3950_s11 + $0x64] sm:$0xf] }
  0xb3   : > { %v2790_v43 = vrot.slane %v2788_v37, 4  ;;  %v2796_v47 = vrot.slane %v2794_v17, 5  ;;  %v2420_v48 = vshll.u32 %v3443_v34, 16  ;;  %v2426_v49 = vshll.u32 %v3444_v38, 16  ;;  %v3488_v36 = vld [vmem:[%s3950_s11 + $0x68] sm:$0xf] }
  0xb4   : > { %3747 = vmatmul.mubr.msk.bf16.vlgmr.msra.gmra.mxu0 %vm486_vm3, %v3501_v16  ;;  %v2415_v46 = vsel %vm3978_vm4, %v2410_v39, %v2414_v31  ;;  %v2782_v52 = vrot.slane %v2781_v42, 4  ;;  %v2419_v54 = vrot.slane %v2417_v14, 4  ;;  %v2430_v55 = vshrl.u32 %v3444_v38, 16 }
  0xb5   : > { %v3461_v51 = vcombine.low %v2405_v41, %v2415_v46  ;;  %v2791_v53 = vor.u32 %v2790_v43, %v2786_v40  ;;  %v2422_v12 = vrot.slane %v2420_v48, 5  ;;  %v2428_v15 = vrot.slane %v2426_v49, 5  ;;  %v3489_v41 = vld [vmem:[%s3950_s11 + $0x6c] sm:$0x1]  ;;  %v3449_v48 = vld [vmem:[%s3950_s11 + $0x80] sm:$0xf] }
  0xb6   : > { %v2436_v56 = vshll.u32 %v3445_v45, 16  ;;  %v2787_v57 = vsel %vm3978_vm4, %v2782_v52, %v2786_v40  ;;  %v2799_v11 = vshrl.u32 %v3484_v50, 16  ;;  %v2802_v59 = vshll.u32 %v3484_v50, 16 }
  0xb7   : > { %3732 = vmatprep.mubr.msk.bf16.mxu1 %vm486_vm3, %v3461_v51  ;;  %v2792_v58 = vrot.slane %v2791_v53, 4  ;;  %v2423_v60 = vor.u32 %v2422_v12, %v2419_v54  ;;  %v2432_v61 = vrot.slane %v2430_v55, 4  ;;  %v2808_v63 = vshll.u32 %v3485_v7, 16  ;;  %v3450_v53 = vld [vmem:[%s3950_s11 + $0x84] sm:$0xf] }
  0xb8   : > { %v2438_v62 = vrot.slane %v2436_v56, 5  ;;  %v2801_v1 = vrot.slane %v2799_v11, 4  ;;  %v2804_v2 = vrot.slane %v2802_v59, 5  ;;  %v2812_v6 = vshrl.u32 %v3485_v7, 16 }
  0xb9   : > { %v2797_v0 = vsel %vm3978_vm4, %v2792_v58, %v2796_v47  ;;  %v2424_v4 = vrot.slane %v2423_v60, 4  ;;  %v2433_v19 = vor.u32 %v2432_v61, %v2428_v15  ;;  %v2810_v20 = vrot.slane %v2808_v63, 5  ;;  %v3451_v60 = vld [vmem:[%s3950_s11 + $0x88] sm:$0x1] }
  0xba   : > { %v3502_v18 = vcombine.low %v2787_v57, %v2797_v0  ;;  %v2805_v21 = vor.u32 %v2804_v2, %v2801_v1  ;;  %v2814_v22 = vrot.slane %v2812_v6, 4  ;;  %v2818_v23 = vshll.u32 %v3486_v10, 16  ;;  %v3491_v2 = vld [vmem:[%s3950_s11 + $0x7c] sm:$0xf] }
  0xbb   : > { %v2441_v9 = vshrl.u32 %v3446_v13, 16  ;;  %v2429_v24 = vsel %vm3978_vm4, %v2424_v4, %v2428_v15  ;;  %v2434_v25 = vrot.slane %v2433_v19, 4  ;;  %v2444_v27 = vshll.u32 %v3446_v13, 16 }
  0xbc   : > { %3750 = vmatprep.mubr.msk.bf16.mxu0 %vm486_vm3, %v3502_v18  ;;  %v2450_v28 = vshll.u32 %v3447_v3, 16  ;;  %v2806_v29 = vrot.slane %v2805_v21, 4  ;;  %v2815_v8 = vor.u32 %v2814_v22, %v2810_v20  ;;  %v2820_v30 = vrot.slane %v2818_v23, 5 }
  0xbd   : > { %v2443_v31 = vrot.slane %v2441_v9, 4  ;;  %v2439_v33 = vsel %vm3978_vm4, %v2434_v25, %v2438_v62  ;;  %v2446_v34 = vrot.slane %v2444_v27, 5  ;;  %v2454_v5 = vshrl.u32 %v3447_v3, 16  ;;  %v3490_v62 = vld [vmem:[%s3950_s11 + $0x78] sm:$0xf] }
  0xbe   : > { %v2452_v35 = vrot.slane %v2450_v28, 5  ;;  %v3462_v37 = vcombine.low %v2429_v24, %v2439_v33  ;;  %v2811_v38 = vsel %vm3978_vm4, %v2806_v29, %v2810_v20  ;;  %v2816_v16 = vrot.slane %v2815_v8, 4  ;;  %v3492_v24 = vld [vmem:[%s3950_s11 + $0x80] sm:$0x1]  ;;  %v3452_v27 = vld [vmem:[%s3950_s11 + $0x94] sm:$0xf] }
  0xbf   : > { %v2460_v39 = vshll.u32 %v3448_v26, 16  ;;  %v2447_v40 = vor.u32 %v2446_v34, %v2443_v31  ;;  %v2456_v17 = vrot.slane %v2454_v5, 4  ;;  %v2823_v42 = vshrl.u32 %v3487_v32, 16  ;;  %v3453_v31 = vld [vmem:[%s3950_s11 + $0x98] sm:$0xf] }
  0xc0   : > { %v2826_v43 = vshll.u32 %v3487_v32, 16  ;;  %3733 = vmatmul.mubr.msk.bf16.gmra.mxu1 %vm486_vm3, %v3462_v37  ;;  %v2821_v45 = vsel %vm3978_vm4, %v2816_v16, %v2820_v30  ;;  %v2832_v46 = vshll.u32 %v3488_v36, 16  ;;  %v2836_v47 = vshrl.u32 %v3488_v36, 16 }
  0xc1   : > { %v2462_v14 = vrot.slane %v2460_v39, 5  ;;  %v3503_v49 = vcombine.low %v2811_v38, %v2821_v45  ;;  %v2448_v50 = vrot.slane %v2447_v40, 4  ;;  %v2457_v51 = vor.u32 %v2456_v17, %v2452_v35  ;;  %v3454_v38 = vld [vmem:[%s3950_s11 + $0x9c] sm:$0x1] }
  0xc2   : > { %v2825_v52 = vrot.slane %v2823_v42, 4  ;;  %v2828_v54 = vrot.slane %v2826_v43, 5  ;;  %v2834_v7 = vrot.slane %v2832_v46, 5  ;;  %v2838_v12 = vrot.slane %v2836_v47, 4  ;;  %v3493_v42 = vld [vmem:[%s3950_s11 + $0x8c] sm:$0xf] }
  0xc3   : > { %v2842_v15 = vshll.u32 %v3489_v41, 16  ;;  %3751 = vmatmul.mubr.msk.bf16.gmra.mxu0 %vm486_vm3, %v3503_v49  ;;  %v2453_v55 = vsel %vm3978_vm4, %v2448_v50, %v2452_v35  ;;  %v2458_v56 = vrot.slane %v2457_v51, 4  ;;  %v2465_v57 = vshrl.u32 %v3449_v48, 16  ;;  %v3494_v51 = vld [vmem:[%s3950_s11 + $0x90] sm:$0xf] }
  0xc4   : > { %v2468_v58 = vshll.u32 %v3449_v48, 16  ;;  %v2829_v10 = vor.u32 %v2828_v54, %v2825_v52  ;;  %v2839_v11 = vor.u32 %v2838_v12, %v2834_v7  ;;  %v2474_v61 = vshll.u32 %v3450_v53, 16 }
  0xc5   : > { %v2844_v59 = vrot.slane %v2842_v15, 5  ;;  %v2463_v63 = vsel %vm3978_vm4, %v2458_v56, %v2462_v14  ;;  %v2467_v13 = vrot.slane %v2465_v57, 4  ;;  %v2478_v1 = vshrl.u32 %v3450_v53, 16  ;;  %v3495_v56 = vld [vmem:[%s3950_s11 + $0x94] sm:$0x1] }
  0xc6   : > { %v2470_v0 = vrot.slane %v2468_v58, 5  ;;  %v3463_v6 = vcombine.low %v2453_v55, %v2463_v63  ;;  %v2830_v3 = vrot.slane %v2829_v10, 4  ;;  %v2840_v18 = vrot.slane %v2839_v11, 4 }
  0xc7   : > { %v2476_v4 = vrot.slane %v2474_v61, 5  ;;  %v2480_v20 = vrot.slane %v2478_v1, 4  ;;  %v2484_v21 = vshll.u32 %v3451_v60, 16  ;;  %v2847_v22 = vshrl.u32 %v3490_v62, 16  ;;  %v3455_v60 = vld [vmem:[%s3950_s11 + $0xa8] sm:$0xf] }
  0xc8   : > { %v2471_v19 = vor.u32 %v2470_v0, %v2467_v13  ;;  %3736 = vmatprep.mubr.msk.bf16.mxu1 %vm486_vm3, %v3463_v6  ;;  %v2835_v23 = vsel %vm3978_vm4, %v2830_v3, %v2834_v7  ;;  %v2845_v9 = vsel %vm3978_vm4, %v2840_v18, %v2844_v59  ;;  %v2850_v25 = vshll.u32 %v3490_v62, 16  ;;  %v3456_v0 = vld [vmem:[%s3950_s11 + $0xac] sm:$0xf] }
  0xc9   : > { %v2856_v26 = vshll.u32 %v3491_v2, 16  ;;  %v3504_v28 = vcombine.low %v2835_v23, %v2845_v9  ;;  %v2481_v8 = vor.u32 %v2480_v20, %v2476_v4  ;;  %v2486_v30 = vrot.slane %v2484_v21, 5  ;;  %v3457_v20 = vld [vmem:[%s3950_s11 + $0xb0] sm:$0x1] }
  0xca   : > { %v2472_v29 = vrot.slane %v2471_v19, 4  ;;  %v2849_v32 = vrot.slane %v2847_v22, 4  ;;  %v2852_v33 = vrot.slane %v2850_v25, 5  ;;  %v2860_v35 = vshrl.u32 %v3491_v2, 16  ;;  %v3496_v25 = vld [vmem:[%s3950_s11 + $0xa0] sm:$0xf] }
  0xcb   : > { %v2858_v34 = vrot.slane %v2856_v26, 5  ;;  %3754 = vmatprep.mubr.msk.bf16.mxu0 %vm486_vm3, %v3504_v28  ;;  %v2482_v36 = vrot.slane %v2481_v8, 4  ;;  %v2866_v37 = vshll.u32 %v3492_v24, 16  ;;  %v2489_v16 = vshrl.u32 %v3452_v27, 16  ;;  %v3497_v8 = vld [vmem:[%s3950_s11 + $0xa4] sm:$0xf] }
  0xcc   : > { %v2477_v5 = vsel %vm3978_vm4, %v2472_v29, %v2476_v4  ;;  %v2853_v39 = vor.u32 %v2852_v33, %v2849_v32  ;;  %v2862_v40 = vrot.slane %v2860_v35, 4  ;;  %v2492_v17 = vshll.u32 %v3452_v27, 16 }
  0xcd   : > { %v2498_v41 = vshll.u32 %v3453_v31, 16  ;;  %v2487_v43 = vsel %vm3978_vm4, %v2482_v36, %v2486_v30  ;;  %v2868_v45 = vrot.slane %v2866_v37, 5  ;;  %v2491_v14 = vrot.slane %v2489_v16, 4 }
  0xce   : > { %v2502_v46 = vshrl.u32 %v3453_v31, 16  ;;  %v3464_v47 = vcombine.low %v2477_v5, %v2487_v43  ;;  %v2854_v48 = vrot.slane %v2853_v39, 4  ;;  %v2863_v49 = vor.u32 %v2862_v40, %v2858_v34  ;;  %v3498_v39 = vld [vmem:[%s3950_s11 + $0xa8] sm:$0x1] }
  0xcf   : > { %v2494_v50 = vrot.slane %v2492_v17, 5  ;;  %v2500_v52 = vrot.slane %v2498_v41, 5  ;;  %v2508_v54 = vshll.u32 %v3454_v38, 16  ;;  %v2871_v7 = vshrl.u32 %v3493_v42, 16 }
  0xd0   : > { %v2504_v53 = vrot.slane %v2502_v46, 4  ;;  %3737 = vmatmul.mubr.msk.bf16.gmra.mxu1 %vm486_vm3, %v3464_v47  ;;  %v2859_v12 = vsel %vm3978_vm4, %v2854_v48, %v2858_v34  ;;  %v2864_v15 = vrot.slane %v2863_v49, 4  ;;  %v2874_v57 = vshll.u32 %v3493_v42, 16 }
  0xd1   : > { %v2495_v55 = vor.u32 %v2494_v50, %v2491_v14  ;;  %v2510_v10 = vrot.slane %v2508_v54, 5  ;;  %v2873_v11 = vrot.slane %v2871_v7, 4  ;;  %v2880_v59 = vshll.u32 %v3494_v51, 16 }
  0xd2   : > { %v2505_v58 = vor.u32 %v2504_v53, %v2500_v52  ;;  %v2869_v61 = vsel %vm3978_vm4, %v2864_v15, %v2868_v45  ;;  %v2876_v63 = vrot.slane %v2874_v57, 5  ;;  %v2884_v13 = vshrl.u32 %v3494_v51, 16 }
  0xd3   : > { %v2496_v62 = vrot.slane %v2495_v55, 4  ;;  %v3505_v1 = vcombine.low %v2859_v12, %v2869_v61  ;;  %v2882_v6 = vrot.slane %v2880_v59, 5  ;;  %v2890_v3 = vshll.u32 %v3495_v56, 16 }
  0xd4   : > { %v2506_v2 = vrot.slane %v2505_v58, 4  ;;  %v2877_v4 = vor.u32 %v2876_v63, %v2873_v11  ;;  %v2886_v19 = vrot.slane %v2884_v13, 4  ;;  %v2513_v21 = vshrl.u32 %v3455_v60, 16 }
  0xd5   : > { %v2501_v18 = vsel %vm3978_vm4, %v2496_v62, %v2500_v52  ;;  %3755 = vmatmul.mubr.msk.bf16.gmra.mxu0 %vm486_vm3, %v3505_v1  ;;  %v2892_v23 = vrot.slane %v2890_v3, 5  ;;  %v2516_v9 = vshll.u32 %v3455_v60, 16  ;;  %v2522_v24 = vshll.u32 %v3456_v0, 16 }
  0xd6   : > { %v2511_v22 = vsel %vm3978_vm4, %v2506_v2, %v2510_v10  ;;  %v2878_v27 = vrot.slane %v2877_v4, 4  ;;  %v2887_v28 = vor.u32 %v2886_v19, %v2882_v6  ;;  %v2515_v29 = vrot.slane %v2513_v21, 4 }
  0xd7   : > { %v3465_v26 = vcombine.low %v2501_v18, %v2511_v22  ;;  %v2518_v30 = vrot.slane %v2516_v9, 5  ;;  %v2524_v31 = vrot.slane %v2522_v24, 5  ;;  %v2526_v32 = vshrl.u32 %v3456_v0, 16 }
  0xd8   : > { %v2532_v33 = vshll.u32 %v3457_v20, 16  ;;  %v2883_v34 = vsel %vm3978_vm4, %v2878_v27, %v2882_v6  ;;  %v2888_v35 = vrot.slane %v2887_v28, 4  ;;  %v2895_v5 = vshrl.u32 %v3496_v25, 16 }
  0xd9   : > { %3740 = vmatprep.mubr.msk.bf16.mxu1 %vm486_vm3, %v3465_v26  ;;  %v2898_v36 = vshll.u32 %v3496_v25, 16  ;;  %v2519_v37 = vor.u32 %v2518_v30, %v2515_v29  ;;  %v2528_v38 = vrot.slane %v2526_v32, 4  ;;  %v2904_v40 = vshll.u32 %v3497_v8, 16 }
  0xda   : > { %v2534_v16 = vrot.slane %v2532_v33, 5  ;;  %v2893_v17 = vsel %vm3978_vm4, %v2888_v35, %v2892_v23  ;;  %v2897_v41 = vrot.slane %v2895_v5, 4  ;;  %v2908_v43 = vshrl.u32 %v3497_v8, 16 }
  0xdb   : > { %v2900_v42 = vrot.slane %v2898_v36, 5  ;;  %v3506_v45 = vcombine.low %v2883_v34, %v2893_v17  ;;  %v2520_v14 = vrot.slane %v2519_v37, 4  ;;  %v2529_v46 = vor.u32 %v2528_v38, %v2524_v31 }
  0xdc   : > { %v2906_v47 = vrot.slane %v2904_v40, 5  ;;  %v2910_v49 = vrot.slane %v2908_v43, 4  ;;  %v2914_v50 = vshll.u32 %v3498_v39, 16  ;;  %vm3107_vm5 = vcmask 64512  }
  0xdd   : > { %v2901_v48 = vor.u32 %v2900_v42, %v2897_v41  ;;  %3758 = vmatprep.mubr.msk.bf16.mxu0 %vm486_vm3, %v3506_v45  ;;  %v2525_v51 = vsel %vm3978_vm4, %v2520_v14, %v2524_v31  ;;  %v2530_v52 = vrot.slane %v2529_v46, 4 }
  0xde   : > { %v2911_v54 = vor.u32 %v2910_v49, %v2906_v47  ;;  %v2916_v7 = vrot.slane %v2914_v50, 5 }
  0xdf   : > { %v2902_v53 = vrot.slane %v2901_v48, 4  ;;  %v2535_v12 = vsel %vm3978_vm4, %v2530_v52, %v2534_v16 }
  0xe0   : > { %v3466_v15 = vcombine.low %v2525_v51, %v2535_v12  ;;  %v2912_v56 = vrot.slane %v2911_v54, 4 }
  0xe1   : > { %v2907_v55 = vsel %vm3978_vm4, %v2902_v53, %v2906_v47 }
  0xe2   : > { %3741 = vmatmul.mubr.msk.bf16.gmra.mxu1 %vm486_vm3, %v3466_v15  ;;  %v2917_v57 = vsel %vm3978_vm4, %v2912_v56, %v2916_v7 }
  0xe3   : > { %v3507_v58 = vcombine.low %v2907_v55, %v2917_v57 }
  0xe5   : > { %3759 = vmatmul.mubr.msk.bf16.gmra.mxu0 %vm486_vm3, %v3507_v58 }
  0xe6   : > { %v3604_v10 = vpop.f32.mrf.mxu0 }
  0xe8   : > { %v549_v59 = vpop.f32.mrf.mxu0 }
  0xea   : > { %v3605_v61 = vpop.f32.mrf.mxu0 }
  0xec   : > { %v3612_v11 = vpop.f32.mrf.mxu1  ;;  %v552_v63 = vpop.f32.mrf.mxu0 }
  0xee   : > { %v581_v60 = vpop.f32.mrf.mxu1 }
  0xf0   : > { %v3613_v62 = vpop.f32.mrf.mxu1 }
  0xf2   : > { %v584_v13 = vpop.f32.mrf.mxu1 }
  0xf8   : > { %v3608_v0 = vpop.f32.mrf.mxu0 }
  0xfa   : > { %v565_v1 = vpop.f32.mrf.mxu0 }
  0xfb   : > { %v3616_v2 = vpop.f32.mrf.mxu1 }
  0xfc   : > { %v3609_v6 = vpop.f32.mrf.mxu0 }
  0xfd   : > { %v597_v3 = vpop.f32.mrf.mxu1 }
  0xfe   : > { %v568_v4 = vpop.f32.mrf.mxu0 }
  0xff   : > { %v3617_v18 = vpop.f32.mrf.mxu1 }
 0x101   : > { %v600_v44 = vpop.f32.mrf.mxu1 }
 0x103   : > { %v3622_v19 = vpop.f32.mrf.mxu1 }
 0x104   : > { %v3640_v20 = vpop.f32.mrf.mxu0  ;;  %v722_v21 = vadd.f32 %v3622_v19, %v3604_v10 }
 0x105   : > { %v713_v22 = vpop.f32.mrf.mxu1 }
 0x106   : > { %v1079_v23 = vpop.f32.mrf.mxu0  ;;  %v4426_v9 = vadd.f32 %v3640_v20, %v722_v21  ;;  %v714_v24 = vadd.f32 %v713_v22, %v549_v59 }
 0x107   : > { %v3623_v25 = vpop.f32.mrf.mxu1 }
 0x108   : > { %v3641_v26 = vpop.f32.mrf.mxu0  ;;  %v4428_v27 = vadd.f32 %v1079_v23, %v714_v24  ;;  %v725_v28 = vadd.f32 %v3623_v25, %v3605_v61 }
 0x109   : > { %v716_v29 = vpop.f32.mrf.mxu1 }
 0x10a   : > { %v1082_v8 = vpop.f32.mrf.mxu0  ;;  %v4430_v30 = vadd.f32 %v3641_v26, %v725_v28  ;;  %v717_v31 = vadd.f32 %v716_v29, %v552_v63 }
 0x10b   : > { %v3626_v32 = vpop.f32.mrf.mxu1 }
 0x10c   : > { %v4432_v33 = vadd.f32 %v1082_v8, %v717_v31  ;;  %v738_v34 = vadd.f32 %v3626_v32, %v3608_v0 }
 0x10d   : > { %v729_v5 = vpop.f32.mrf.mxu1 }
 0x10e   : > { %v3644_v35 = vpop.f32.mrf.mxu0  ;;  %v730_v37 = vadd.f32 %v729_v5, %v565_v1 }
 0x10f   : > { %v1148_v36 = vadd.f32 %v3644_v35, %v738_v34  ;;  %v3627_v16 = vpop.f32.mrf.mxu1 }
 0x110   : > { %v1095_v38 = vpop.f32.mrf.mxu0  ;;  %v741_v40 = vadd.f32 %v3627_v16, %v3609_v6 }
 0x111   : > { %v1146_v39 = vadd.f32 %v1095_v38, %v730_v37  ;;  %v732_v41 = vpop.f32.mrf.mxu1 }
 0x112   : > { %v3645_v17 = vpop.f32.mrf.mxu0  ;;  %v733_v43 = vadd.f32 %v732_v41, %v568_v4 }
 0x113   : > { %v1149_v42 = vadd.f32 %v3645_v17, %v741_v40  ;;  %v3630_v14 = vpop.f32.mrf.mxu1 }
 0x114   : > { %v1098_v45 = vpop.f32.mrf.mxu0  ;;  %v754_v47 = vadd.f32 %v3630_v14, %v3612_v11 }
 0x115   : > { %v1147_v46 = vadd.f32 %v1098_v45, %v733_v43  ;;  %v745_v49 = vpop.f32.mrf.mxu1 }
 0x116   : > { %v3648_v48 = vpop.f32.mrf.mxu0  ;;  %v746_v51 = vadd.f32 %v745_v49, %v581_v60 }
 0x117   : > { %v1152_v50 = vadd.f32 %v3648_v48, %v754_v47  ;;  %v3631_v53 = vpop.f32.mrf.mxu1 }
 0x118   : > { %v1111_v52 = vpop.f32.mrf.mxu0  ;;  %v757_v7 = vadd.f32 %v3631_v53, %v3613_v62 }
 0x119   : > { %v1150_v54 = vadd.f32 %v1111_v52, %v746_v51  ;;  %v748_v15 = vpop.f32.mrf.mxu1 }
 0x11a   : > { %v3649_v12 = vpop.f32.mrf.mxu0  ;;  %v749_v56 = vadd.f32 %v748_v15, %v584_v13 }
 0x11b   : > { %v1153_v55 = vadd.f32 %v3649_v12, %v757_v7  ;;  %v3634_v58 = vpop.f32.mrf.mxu1 }
 0x11c   : > { %v1114_v57 = vpop.f32.mrf.mxu0  ;;  %v770_v59 = vadd.f32 %v3634_v58, %v3616_v2 }
 0x11d   : > { %v1151_v10 = vadd.f32 %v1114_v57, %v749_v56  ;;  %v761_v63 = vpop.f32.mrf.mxu1 }
 0x11e   : > { %v3652_v61 = vpop.f32.mrf.mxu0  ;;  %v762_v11 = vadd.f32 %v761_v63, %v597_v3 }
 0x11f   : > { %v1156_v0 = vadd.f32 %v3652_v61, %v770_v59  ;;  %v3635_v6 = vpop.f32.mrf.mxu1 }
 0x120   : > { %v1127_v1 = vpop.f32.mrf.mxu0  ;;  %v773_v60 = vadd.f32 %v3635_v6, %v3617_v18 }
 0x121   : > { %v1154_v4 = vadd.f32 %v1127_v1, %v762_v11  ;;  %v764_v20 = vpop.f32.mrf.mxu1 }
 0x122   : > { %v3653_v19 = vpop.f32.mrf.mxu0  ;;  %v765_v62 = vadd.f32 %v764_v20, %v600_v44 }
 0x123   : > { %v1157_v21 = vadd.f32 %v3653_v19, %v773_v60  ;;  %v4434_v23 = vpop.f32.mrf.mxu1 }
 0x124   : > { %v1130_v22 = vpop.f32.mrf.mxu0 }
 0x125   : > { %v1155_v13 = vadd.f32 %v1130_v22, %v765_v62  ;;  %v4438_v25 = vpop.f32.mrf.mxu1 }
 0x126   : > { %v4436_v24 = vpop.f32.mrf.mxu0 }
 0x127   : > { %v4442_v26 = vpop.f32.mrf.mxu1 }
 0x128   : > { %v4440_v2 = vpop.f32.mrf.mxu0 }
 0x129   : > { %v4446_v28 = vpop.f32.mrf.mxu1 }
 0x12a   : > { %v4444_v3 = vpop.f32.mrf.mxu0 }
 0x12b   : > { %v3662_v29 = vpop.f32.mrf.mxu1 }
 0x12c   : > { %v4448_v18 = vpop.f32.mrf.mxu0  ;;  %v1347_v44 = vadd.f32 %v3662_v29, %v1148_v36 }
 0x12d   : > { %v1294_v8 = vpop.f32.mrf.mxu1 }
 0x12e   : > { %v1345_v31 = vadd.f32 %v1294_v8, %v1146_v39 }
 0x12f   : > { %v3663_v34 = vpop.f32.mrf.mxu1 }
 0x130   : > { %v3680_v32 = vpop.f32.mrf.mxu0  ;;  %v1348_v5 = vadd.f32 %v3663_v34, %v1149_v42 }
 0x131   : > { %v4450_v35 = vadd.f32 %v3680_v32, %v1347_v44  ;;  %v1297_v38 = vpop.f32.mrf.mxu1 }
 0x132   : > { %v1676_v37 = vpop.f32.mrf.mxu0  ;;  %v1346_v40 = vadd.f32 %v1297_v38, %v1147_v46 }
 0x133   : > { %v4452_v16 = vadd.f32 %v1676_v37, %v1345_v31  ;;  %v3666_v41 = vpop.f32.mrf.mxu1 }
 0x134   : > { %v3681_v17 = vpop.f32.mrf.mxu0  ;;  %v1351_v45 = vadd.f32 %v3666_v41, %v1152_v50 }
 0x135   : > { %v4454_v43 = vadd.f32 %v3681_v17, %v1348_v5  ;;  %v1310_v47 = vpop.f32.mrf.mxu1 }
 0x136   : > { %v1679_v14 = vpop.f32.mrf.mxu0  ;;  %v1349_v39 = vadd.f32 %v1310_v47, %v1150_v54 }
 0x137   : > { %v4456_v36 = vadd.f32 %v1679_v14, %v1346_v40  ;;  %v3667_v49 = vpop.f32.mrf.mxu1 }
 0x138   : > { %v3684_v48 = vpop.f32.mrf.mxu0  ;;  %v1352_v42 = vadd.f32 %v3667_v49, %v1153_v55 }
 0x139   : > { %v4458_v51 = vadd.f32 %v3684_v48, %v1351_v45  ;;  %v1313_v53 = vpop.f32.mrf.mxu1 }
 0x13a   : > { %v1692_v52 = vpop.f32.mrf.mxu0  ;;  %v1350_v46 = vadd.f32 %v1313_v53, %v1151_v10 }
 0x13b   : > { %v4460_v7 = vadd.f32 %v1692_v52, %v1349_v39  ;;  %v3670_v15 = vpop.f32.mrf.mxu1 }
 0x13c   : > { %v3685_v12 = vpop.f32.mrf.mxu0  ;;  %v1355_v50 = vadd.f32 %v3670_v15, %v1156_v0  ;;  %v1343_v15 = vadd.f32 %v4434_v23, %v4426_v9 }
 0x13d   : > { %v4462_v56 = vadd.f32 %v3685_v12, %v1352_v42  ;;  %v1326_v58 = vpop.f32.mrf.mxu1 }
 0x13e   : > { %v1695_v57 = vpop.f32.mrf.mxu0  ;;  %v1353_v54 = vadd.f32 %v1326_v58, %v1154_v4 }
 0x13f   : > { %v4464_v59 = vadd.f32 %v1695_v57, %v1350_v46  ;;  %v3671_v63 = vpop.f32.mrf.mxu1 }
 0x140   : > { %v3688_v61 = vpop.f32.mrf.mxu0  ;;  %v1356_v55 = vadd.f32 %v3671_v63, %v1157_v21 }
 0x141   : > { %v4466_v11 = vadd.f32 %v3688_v61, %v1355_v50  ;;  %v1329_v6 = vpop.f32.mrf.mxu1  ;;  %v1341_v50 = vadd.f32 %v4438_v25, %v4428_v27  ;;  %v1344_v61 = vadd.f32 %v4442_v26, %v4430_v30 }
 0x142   : > { %v1708_v1 = vpop.f32.mrf.mxu0  ;;  %v1354_v10 = vadd.f32 %v1329_v6, %v1155_v13 }
 0x143   : > { %v4468_v60 = vadd.f32 %v1708_v1, %v1353_v54  ;;  %v1725_v54 = vadd.f32 %v4436_v24, %v1343_v15  ;;  %v1723_v63 = vadd.f32 %v4440_v2, %v1341_v50  ;;  %v1726_v23 = vadd.f32 %v4444_v3, %v1344_v61  ;;  %v4538_v3 = vld [vmem:[%s4640_s2] ss:$0 sm:$0xff] }
 0x144   : > { %v3689_v19 = vpop.f32.mrf.mxu0 }
 0x145   : > { %v4470_v20 = vadd.f32 %v3689_v19, %v1356_v55  ;;  %v1342_v55 = vadd.f32 %v4446_v28, %v4432_v33 }
 0x146   : > { %v1711_v62 = vpop.f32.mrf.mxu0 }
 0x147   : > { %v4472_v0 = vadd.f32 %v1711_v62, %v1354_v10  ;;  %v3694_v22 = vpop.f32.mrf.mxu1  ;;  %v1724_v6 = vadd.f32 %v4448_v18, %v1342_v55 }
 0x148   : > { %v3712_v29 = vpop.f32.mrf.mxu0  ;;  %v2107_v1 = vadd.f32 %v3694_v22, %v1725_v54 }
 0x149   : > { %v2042_v44 = vpop.f32.mrf.mxu1 }
 0x14a   : > { %v2241_v4 = vpop.f32.mrf.mxu0  ;;  %v2105_v25 = vadd.f32 %v2042_v44, %v1723_v63  ;;  %v2306_v24 = vadd.f32 %v3712_v29, %v2107_v1 }
 0x14b   : > { %v3695_v8 = vpop.f32.mrf.mxu1 }
 0x14c   : > { %v3713_v31 = vpop.f32.mrf.mxu0  ;;  %v2108_v10 = vadd.f32 %v3695_v8, %v1726_v23  ;;  %v2304_v2 = vadd.f32 %v2241_v4, %v2105_v25 }
 0x14d   : > { %v2045_v32 = vpop.f32.mrf.mxu1 }
 0x14e   : > { %v2244_v34 = vpop.f32.mrf.mxu0  ;;  %v2106_v26 = vadd.f32 %v2045_v32, %v1724_v6  ;;  %v2307_v62 = vadd.f32 %v3713_v31, %v2108_v10 }
 0x150   : > { %v4474_v21 = vpop.f32.mrf.mxu0  ;;  %v2305_v18 = vadd.f32 %v2244_v34, %v2106_v26 }
 0x151   : > { %v4476_v5 = vpop.f32.mrf.mxu1 }
 0x152   : > { %v4478_v37 = vpop.f32.mrf.mxu0  ;;  %v2111_v25 = vadd.f32 %v4476_v5, %v4450_v35 }
 0x153   : > { %v4480_v13 = vpop.f32.mrf.mxu1 }
 0x154   : > { %v4482_v38 = vpop.f32.mrf.mxu0  ;;  %v2310_v10 = vadd.f32 %v4474_v21, %v2111_v25 }
 0x155   : > { %v4484_v40 = vpop.f32.mrf.mxu1 }
 0x156   : > { %v4486_v17 = vpop.f32.mrf.mxu0 }
 0x157   : > { %v4488_v41 = vpop.f32.mrf.mxu1 }
 0x158   : > { %v4490_v45 = vpop.f32.mrf.mxu0  ;;  %v2110_v35 = vadd.f32 %v4488_v41, %v4456_v36 }
 0x159   : > { %v4492_v14 = vpop.f32.mrf.mxu1 }
 0x15a   : > { %v4494_v47 = vpop.f32.mrf.mxu0  ;;  %v2309_v21 = vadd.f32 %v4486_v17, %v2110_v35 }
 0x15b   : > { %v4496_v39 = vpop.f32.mrf.mxu1 }
 0x15c   : > { %v4498_v48 = vpop.f32.mrf.mxu0 }
 0x15d   : > { %v4500_v49 = vpop.f32.mrf.mxu1 }
 0x15e   : > { %v4504_v52 = vpop.f32.mrf.mxu0 }
 0x15f   : > { %v4502_v42 = vpop.f32.mrf.mxu1 }
 0x160   : > { %v4508_v46 = vpop.f32.mrf.mxu0 }
 0x161   : > { %v4506_v53 = vpop.f32.mrf.mxu1 }
 0x162   : > { %v4518_v58 = vpop.f32.mrf.mxu0 }
 0x163   : > { %v4510_v12 = vpop.f32.mrf.mxu1 }
 0x164   : > { %v4529_v27 = vpop.f32.mrf.mxu0  ;;  %v2117_v35 = vadd.f32 %v4510_v12, %v4468_v60 }
 0x165   : > { %v4516_v57 = vpop.f32.mrf.mxu1 }
 0x166   : > { %v4533_v30 = vpop.f32.mrf.mxu0 }
 0x167   : > { %v4527_v9 = vpop.f32.mrf.mxu1 }
 0x16e   : > { %v3730_v19 = vpop.f32.mrf.mxu1 }
 0x16f   : > { %v2688_v33 = vadd.f32 %v3730_v19, %v2306_v24  ;;  %v2109_v24 = vadd.f32 %v4480_v13, %v4452_v16  ;;  %v2112_v19 = vadd.f32 %v4484_v40, %v4454_v43 }
 0x170   : > { %v2623_v28 = vpop.f32.mrf.mxu1 }
 0x171   : > { %v2686_v22 = vadd.f32 %v2623_v28, %v2304_v2  ;;  %v2308_v26 = vadd.f32 %v4478_v37, %v2109_v24  ;;  %v2311_v28 = vadd.f32 %v4482_v38, %v2112_v19 }
 0x172   : > { %v3731_v15 = vpop.f32.mrf.mxu1 }
 0x173   : > { %v2689_v44 = vadd.f32 %v3731_v15, %v2307_v62 }
 0x174   : > { %v3748_v50 = vpop.f32.mrf.mxu0  ;;  %v2626_v8 = vpop.f32.mrf.mxu1 }
 0x175   : > { %v3070_v29 = vadd.f32 %v3748_v50, %v2688_v33  ;;  %v2687_v54 = vadd.f32 %v2626_v8, %v2305_v18  ;;  %v2115_v8 = vadd.f32 %v4492_v14, %v4458_v51  ;;  %v2114_v51 = vadd.f32 %v4502_v42, %v4464_v59 }
 0x176   : > { %v3005_v4 = vpop.f32.mrf.mxu0 }
 0x177   : > { %v3093_v31 = vadd.f32 %v4538_v3, %v3070_v29  ;;  %v3068_v32 = vadd.f32 %v3005_v4, %v2686_v22 }
 0x178   : > { %v3749_v61 = vpop.f32.mrf.mxu0 }
 0x179   : > { %3110 = vst.msk [vmem:[%s4543_s21 + $0x10] sm:$0xff] %vm3107_vm5, %v3093_v31  ;;  %v3091_v34 = vadd.f32 %v4538_v3, %v3068_v32  ;;  %v3071_v63 = vadd.f32 %v3749_v61, %v2689_v44  ;;  %v2113_v31 = vadd.f32 %v4496_v39, %v4460_v7  ;;  %v2314_v32 = vadd.f32 %v4490_v45, %v2115_v8 }
 0x17a   : > { %v3008_v55 = vpop.f32.mrf.mxu0  ;;  %v2313_v45 = vadd.f32 %v4504_v52, %v2114_v51 }
 0x17b   : > { %3108 = vst.msk [vmem:[%s4543_s21] sm:$0xff] %vm3107_vm5, %v3091_v34  ;;  %v3094_v1 = vadd.f32 %v4538_v3, %v3071_v63  ;;  %v3069_v23 = vadd.f32 %v3008_v55, %v2687_v54  ;;  %v2116_v54 = vadd.f32 %v4500_v49, %v4462_v56  ;;  %v2312_v34 = vadd.f32 %v4494_v47, %v2113_v31 }
 0x17d   : > { %3111 = vst.msk [vmem:[%s4543_s21 + $0x18] sm:$0xff] %vm3107_vm5, %v3094_v1  ;;  %v3092_v6 = vadd.f32 %v4538_v3, %v3069_v23  ;;  %v2315_v55 = vadd.f32 %v4498_v48, %v2116_v54 }
 0x17f   : > { %3109 = vst.msk [vmem:[%s4543_s21 + $0x8] sm:$0xff] %vm3107_vm5, %v3092_v6 }
 0x180   : > { %v3734_v2 = vpop.f32.mrf.mxu1 }
 0x181   : > { %v2692_v5 = vadd.f32 %v3734_v2, %v2310_v10  ;;  %v2119_v2 = vadd.f32 %v4506_v53, %v4466_v11  ;;  %v2118_v11 = vadd.f32 %v4527_v9, %v4472_v0 }
 0x182   : > { %v2639_v33 = vpop.f32.mrf.mxu1 }
 0x183   : > { %v3752_v62 = vpop.f32.mrf.mxu0  ;;  %v2690_v16 = vadd.f32 %v2639_v33, %v2308_v26  ;;  %v2120_v33 = vadd.f32 %v4516_v57, %v4470_v20 }
 0x184   : > { %v3074_v13 = vadd.f32 %v3752_v62, %v2692_v5  ;;  %v3735_v22 = vpop.f32.mrf.mxu1  ;;  %v2318_v5 = vadd.f32 %v4508_v46, %v2119_v2  ;;  %v2316_v62 = vadd.f32 %v4518_v58, %v2117_v35  ;;  %v2317_v46 = vadd.f32 %v4533_v30, %v2118_v11 }
 0x185   : > { %v3021_v43 = vpop.f32.mrf.mxu0  ;;  %v2693_v40 = vadd.f32 %v3735_v22, %v2311_v28 }
 0x186   : > { %v3097_v37 = vadd.f32 %v4538_v3, %v3074_v13  ;;  %v3072_v15 = vadd.f32 %v3021_v43, %v2690_v16  ;;  %v2642_v36 = vpop.f32.mrf.mxu1  ;;  %v2319_v13 = vadd.f32 %v4529_v27, %v2120_v33 }
 0x187   : > { %v3753_v41 = vpop.f32.mrf.mxu0  ;;  %v2691_v50 = vadd.f32 %v2642_v36, %v2309_v21 }
 0x188   : > { %3114 = vst.msk [vmem:[%s4543_s21 + $0x30] sm:$0xff] %vm3107_vm5, %v3097_v37  ;;  %v3095_v38 = vadd.f32 %v4538_v3, %v3072_v15  ;;  %v3075_v18 = vadd.f32 %v3753_v41, %v2693_v40 }
 0x189   : > { %v3024_v29 = vpop.f32.mrf.mxu0 }
 0x18a   : > { %3112 = vst.msk [vmem:[%s4543_s21 + $0x20] sm:$0xff] %vm3107_vm5, %v3095_v38  ;;  %v3098_v17 = vadd.f32 %v4538_v3, %v3075_v18  ;;  %v3073_v44 = vadd.f32 %v3024_v29, %v2691_v50 }
 0x18c   : > { %3115 = vst.msk [vmem:[%s4543_s21 + $0x38] sm:$0xff] %vm3107_vm5, %v3098_v17  ;;  %v3096_v4 = vadd.f32 %v4538_v3, %v3073_v44 }
 0x18e   : > { %3113 = vst.msk [vmem:[%s4543_s21 + $0x28] sm:$0xff] %vm3107_vm5, %v3096_v4 }
 0x190   : > { %v3738_v61 = vpop.f32.mrf.mxu1 }
 0x191   : > { %v2696_v14 = vadd.f32 %v3738_v61, %v2314_v32 }
 0x192   : > { %v2655_v63 = vpop.f32.mrf.mxu1 }
 0x193   : > { %v2694_v1 = vadd.f32 %v2655_v63, %v2312_v34 }
 0x194   : > { %v3739_v7 = vpop.f32.mrf.mxu1 }
 0x195   : > { %v3756_v39 = vpop.f32.mrf.mxu0  ;;  %v2697_v56 = vadd.f32 %v3739_v7, %v2315_v55 }
 0x196   : > { %v3078_v23 = vadd.f32 %v3756_v39, %v2696_v14  ;;  %v2658_v49 = vpop.f32.mrf.mxu1 }
 0x197   : > { %v3037_v25 = vpop.f32.mrf.mxu0  ;;  %v2695_v42 = vadd.f32 %v2658_v49, %v2313_v45 }
 0x198   : > { %v3101_v47 = vadd.f32 %v4538_v3, %v3078_v23  ;;  %v3076_v59 = vadd.f32 %v3037_v25, %v2694_v1 }
 0x199   : > { %v3757_v6 = vpop.f32.mrf.mxu0 }
 0x19a   : > { %3118 = vst.msk [vmem:[%s4543_s21 + $0x50] sm:$0xff] %vm3107_vm5, %v3101_v47  ;;  %v3099_v48 = vadd.f32 %v4538_v3, %v3076_v59  ;;  %v3079_v24 = vadd.f32 %v3757_v6, %v2697_v56 }
 0x19b   : > { %v3040_v10 = vpop.f32.mrf.mxu0 }
 0x19c   : > { %3116 = vst.msk [vmem:[%s4543_s21 + $0x40] sm:$0xff] %vm3107_vm5, %v3099_v48  ;;  %v3102_v52 = vadd.f32 %v4538_v3, %v3079_v24  ;;  %v3077_v19 = vadd.f32 %v3040_v10, %v2695_v42 }
 0x19e   : > { %3119 = vst.msk [vmem:[%s4543_s21 + $0x58] sm:$0xff] %vm3107_vm5, %v3102_v52  ;;  %v3100_v26 = vadd.f32 %v4538_v3, %v3077_v19 }
 0x1a0   : > { %3117 = vst.msk [vmem:[%s4543_s21 + $0x48] sm:$0xff] %vm3107_vm5, %v3100_v26 }
 0x1a2   : > { %v3742_v28 = vpop.f32.mrf.mxu1 }
 0x1a3   : > { %v2700_v53 = vadd.f32 %v3742_v28, %v2318_v5 }
 0x1a4   : > { %v2671_v16 = vpop.f32.mrf.mxu1 }
 0x1a5   : > { %v3760_v22 = vpop.f32.mrf.mxu0  ;;  %v2698_v60 = vadd.f32 %v2671_v16, %v2316_v62 }
 0x1a6   : > { %v3082_v12 = vadd.f32 %v3760_v22, %v2700_v53  ;;  %v3743_v21 = vpop.f32.mrf.mxu1 }
 0x1a7   : > { %v3053_v20 = vpop.f32.mrf.mxu0  ;;  %v2701_v57 = vadd.f32 %v3743_v21, %v2319_v13 }
 0x1a8   : > { %v3105_v58 = vadd.f32 %v4538_v3, %v3082_v12  ;;  %v3080_v43 = vadd.f32 %v3053_v20, %v2698_v60  ;;  %v2674_v0 = vpop.f32.mrf.mxu1 }
 0x1a9   : > { %v3761_v9 = vpop.f32.mrf.mxu0  ;;  %v2699_v40 = vadd.f32 %v2674_v0, %v2317_v46 }
 0x1aa   : > { %3122 = vst.msk [vmem:[%s4543_s21 + $0x70] sm:$0xff] %vm3107_vm5, %v3105_v58  ;;  %v3103_v27 = vadd.f32 %v4538_v3, %v3080_v43  ;;  %v3083_v37 = vadd.f32 %v3761_v9, %v2701_v57 }
 0x1ab   : > { %v3056_v15 = vpop.f32.mrf.mxu0 }
 0x1ac   : > { %3120 = vst.msk [vmem:[%s4543_s21 + $0x60] sm:$0xff] %vm3107_vm5, %v3103_v27  ;;  %v3106_v36 = vadd.f32 %v4538_v3, %v3083_v37  ;;  %v3081_v30 = vadd.f32 %v3056_v15, %v2699_v40 }
 0x1ae   : > { %3123 = vst.msk [vmem:[%s4543_s21 + $0x78] sm:$0xff] %vm3107_vm5, %v3106_v36  ;;  %v3104_v41 = vadd.f32 %v4538_v3, %v3081_v30 }
 0x1b0   : > { %3121 = vst.msk [vmem:[%s4543_s21 + $0x68] sm:$0xff] %vm3107_vm5, %v3104_v41 }
 0x1b1 PF: > { %s13_s14 = sadd.s32 1, %s3845_s14   ;;  %s4644_s12 = smov %s3841_s13 }
 0x1b2   : > { %p10_p6 = scmp.ge.s32.totalorder %s13_s14, 4   ;;  %s4645_s13 = smov %s4647_s15 }
 0x1b4   :  { %12 = sbr.rel (!%p10_p6) target bundleno = 2 (0x2), region = 78 }

</bundles_post_ra>
